<compile_context>
chip_gen: v7x
topology: tpu7x:2x2x1
jax: 0.10.0
libtpu: 0.0.40
codegen_flags: <defaults>
</compile_context>

<pallas_src>
import functools

import jax
import jax.numpy as jnp
from jax.experimental import pallas as pl
from jax.experimental.pallas import tpu as pltpu


def _round_up(n: int, m: int) -> int:
    return ((n + m - 1) // m) * m


def _fused_mlp_kernel(x_ref, bias_ref, *rest, num_layers: int, out_pads):
    """rest = (w0_ref, ..., w{L-1}_ref, o_ref).

    x_ref:    (TB, F_pad) bf16
    bias_ref: (1, sum(out_pads)) f32, sliced per layer with static offsets
    w_i:      (IN_pad_i, OUT_pad_i) bf16
    o_ref:    (TB, OUT_pad_last) f32
    """
    w_refs = rest[:num_layers]
    o_ref = rest[num_layers]

    h = x_ref[...]                       # bf16 (TB, F_pad)
    off = 0
    for i in range(num_layers):
        out_p = out_pads[i]
        w = w_refs[i][...]               # bf16 (IN_pad, OUT_pad)
        if i > 0:
            # Later (tiny) layers: keep the f32 accumulator as LHS and upcast
            # the bf16-stored weight, so only weight rounding remains.
            w = w.astype(jnp.float32)
        y = jnp.dot(h, w, preferred_element_type=jnp.float32)
        y = y + bias_ref[:, off:off + out_p]     # (1, out_p) broadcasts
        if i < num_layers - 1:
            y = jnp.maximum(y, 0.0)
        h = y                            # f32 from here on
        off += out_p
    o_ref[...] = h.astype(o_ref.dtype)


def fused_mlp(x2d_bf16, weights, bias_cat, output_size, orig_batch):
    """Run the whole MLP in one Pallas call.

    x2d_bf16: (B_pad, F_pad) bfloat16, B_pad multiple of 16, F_pad of 128.
    weights:  list of (IN_pad, OUT_pad) bfloat16 arrays (zero padded).
    bias_cat: (1, sum(OUT_pad)) float32 (zero padded), all biases concatenated.
    Returns (orig_batch, output_size) float32.
    """
    b_pad, f_pad = x2d_bf16.shape
    num_layers = len(weights)
    out_pads = tuple(int(w.shape[1]) for w in weights)
    out_pad = out_pads[-1]

    # Batch tiling: one tile at small B, 128-row tiles (parallel grid) at scale.
    tb = b_pad if b_pad <= 128 else 128
    grid = (b_pad // tb,)

    in_specs = [
        pl.BlockSpec((tb, f_pad), lambda i: (i, 0)),          # activations
        pl.BlockSpec(bias_cat.shape, lambda i: (0, 0)),       # merged biases
    ]
    args = [x2d_bf16, bias_cat]

    flops = 0
    bytes_accessed = (x2d_bf16.size * x2d_bf16.dtype.itemsize
                      + bias_cat.size * bias_cat.dtype.itemsize
                      + b_pad * out_pad * 4)
    for w in weights:
        flops += 2 * b_pad * w.shape[0] * w.shape[1]
        bytes_accessed += w.size * w.dtype.itemsize
        in_specs.append(pl.BlockSpec(w.shape, lambda i: (0, 0)))
        args.append(w)

    kernel = functools.partial(_fused_mlp_kernel, num_layers=num_layers,
                               out_pads=out_pads)
    out = pl.pallas_call(
        kernel,
        grid=grid,
        out_shape=jax.ShapeDtypeStruct((b_pad, out_pad), jnp.float32),
        in_specs=in_specs,
        out_specs=pl.BlockSpec((tb, out_pad), lambda i: (i, 0)),
        cost_estimate=pl.CostEstimate(
            flops=int(flops), transcendentals=0,
            bytes_accessed=int(bytes_accessed)),
        compiler_params=pltpu.CompilerParams(
            dimension_semantics=("parallel",),
            # v5e scoped default is only 16 MiB; 32 MiB fits every generation
            # including v7x's 64 MiB physical VMEM.
            vmem_limit_bytes=32 * 1024 * 1024),
    )(*args)
    return out[:orig_batch, :output_size]


class PallasMLP:
    """Mirror of the PyTorch MLP: Linear+ReLU per hidden size, then final Linear."""

    def __init__(self, input_size, hidden_sizes, output_size, key):
        sizes = [input_size] + list(hidden_sizes) + [output_size]
        self.input_size = input_size
        self.output_size = output_size
        self.num_layers = len(sizes) - 1

        # f32 "source of truth" parameters with torch nn.Linear default init.
        self.params = []
        for i in range(self.num_layers):
            fan_in, fan_out = sizes[i], sizes[i + 1]
            key, wk, bk = jax.random.split(key, 3)
            bound = 1.0 / (fan_in ** 0.5)
            w = jax.random.uniform(wk, (fan_in, fan_out), jnp.float32, -bound, bound)
            b = jax.random.uniform(bk, (fan_out,), jnp.float32, -bound, bound)
            self.params.append((w, b))

        # Kernel-side parameters: widths zero-padded to 128-lane multiples,
        # weights cast to bf16, all biases concatenated into ONE f32 tensor.
        # Zero padding is exact: padded activation columns are ReLU(0+0)=0 and
        # padded output columns/rows are sliced off in the wrapper.
        kernel_weights = []
        bias_chunks = []
        prev_pad = _round_up(input_size, 128)
        for (w, b) in self.params:
            fan_in, fan_out = w.shape
            out_p = _round_up(fan_out, 128)
            w_p = jnp.zeros((prev_pad, out_p), jnp.float32).at[:fan_in, :fan_out].set(w)
            b_p = jnp.zeros((1, out_p), jnp.float32).at[0, :fan_out].set(b)
            kernel_weights.append(w_p.astype(jnp.bfloat16))
            bias_chunks.append(b_p)
            prev_pad = out_p
        self.kernel_weights = kernel_weights
        self.bias_cat = jnp.concatenate(bias_chunks, axis=1)

    def __call__(self, x):
        # x.view(x.size(0), -1)
        b = x.shape[0]
        x2 = x.reshape(b, -1)
        f = x2.shape[1]
        f_pad = _round_up(f, 128)
        b_pad = _round_up(b, 16)           # full bf16 sublane group
        if b_pad > 128:
            b_pad = _round_up(b_pad, 128)  # whole 128-row batch tiles
        if (f_pad != f) or (b_pad != b):
            x2 = jnp.pad(x2, ((0, b_pad - b), (0, f_pad - f)))
        x2 = x2.astype(jnp.bfloat16)       # halves the activation DMA
        return fused_mlp(x2, self.kernel_weights, self.bias_cat,
                         self.output_size, b)


if __name__ == "__main__":
    key = jax.random.PRNGKey(0)
    key, xk, pk = jax.random.split(key, 3)

    # "CNN input": (B, C, H, W) = (2, 4, 16, 16) -> flattened feature size 1024
    B, C, H, W = 2, 4, 16, 16
    x = jax.random.normal(xk, (B, C, H, W), jnp.float32)

    input_size = C * H * W          # 1024
    hidden_sizes = [512, 256]
    output_size = 2                 # e.g. Teff + logg

    model = PallasMLP(input_size, hidden_sizes, output_size, pk)

    out = model(x)
    out = jax.block_until_ready(out)
    assert out.shape == (B, output_size)

    # Reference 1: pure JAX with the SAME precision recipe as the kernel
    # (bf16 x bf16 first layer, f32 LHS x upcast bf16 weight afterwards,
    # f32 accumulation throughout) -> tight tolerance.
    ref = x.reshape(B, -1).astype(jnp.bfloat16)
    for i, (w, b) in enumerate(model.params):
        wq = w.astype(jnp.bfloat16)
        if i == 0:
            ref = jnp.dot(ref, wq, preferred_element_type=jnp.float32) + b
        else:
            ref = jnp.dot(ref, wq.astype(jnp.float32),
                          preferred_element_type=jnp.float32) + b
        if i < model.num_layers - 1:
            ref = jnp.maximum(ref, 0.0)
    assert jnp.allclose(out, ref, atol=5e-3, rtol=5e-3), (out, ref)

    # Reference 2: full-f32 math (original torch semantics), loose tolerance
    # for the bf16 weight/input rounding.
    ref32 = x.reshape(B, -1)
    for i, (w, b) in enumerate(model.params):
        ref32 = ref32 @ w + b
        if i < model.num_layers - 1:
            ref32 = jnp.maximum(ref32, 0.0)
    assert jnp.allclose(out, ref32, atol=5e-2, rtol=5e-2), (out, ref32)

    print("KERNEL_OK")
</pallas_src>

<mosaic_0001>
module attributes {stable_mosaic.version = 11 : i64} {
  func.func @_fused_mlp_kernel(%arg0: i32, %arg1: memref<16x1024xbf16, #tpu.memory_space<vmem>>, %arg2: memref<1x896xf32, #tpu.memory_space<vmem>>, %arg3: memref<1024x512xbf16, #tpu.memory_space<vmem>>, %arg4: memref<512x256xbf16, #tpu.memory_space<vmem>>, %arg5: memref<256x128xbf16, #tpu.memory_space<vmem>>, %arg6: memref<16x128xf32, #tpu.memory_space<vmem>>) attributes {dimension_semantics = [#tpu.dimension_semantics<parallel>], iteration_bounds = array<i64: 1>, scalar_prefetch = 0 : i64, scratch_operands = 0 : i64, tpu.core_type = #tpu.core_type<tc>, window_params = [{transform_indices = @transform_0, window_bounds = array<i64: 16, 1024>}, {pipeline_mode = #tpu.pipeline_mode<synchronous>, transform_indices = @transform_1, window_bounds = array<i64: 1, 896>}, {pipeline_mode = #tpu.pipeline_mode<synchronous>, transform_indices = @transform_2, window_bounds = array<i64: 1024, 512>}, {pipeline_mode = #tpu.pipeline_mode<synchronous>, transform_indices = @transform_3, window_bounds = array<i64: 512, 256>}, {pipeline_mode = #tpu.pipeline_mode<synchronous>, transform_indices = @transform_4, window_bounds = array<i64: 256, 128>}, {transform_indices = @transform_5, window_bounds = array<i64: 16, 128>}]} {
    %c0 = arith.constant 0 : index
    %c0_0 = arith.constant 0 : index
    %0 = vector.load %arg1[%c0, %c0_0] : memref<16x1024xbf16, #tpu.memory_space<vmem>>, vector<16x1024xbf16>
    %c0_1 = arith.constant 0 : index
    %c0_2 = arith.constant 0 : index
    %1 = vector.load %arg3[%c0_1, %c0_2] : memref<1024x512xbf16, #tpu.memory_space<vmem>>, vector<1024x512xbf16>
    %cst = arith.constant dense<0.000000e+00> : vector<16x512xf32>
    %2 = tpu.matmul %0, %1, %cst {dimension_numbers = #tpu.dot_dimension_numbers<[1], [0], [0], [1], [0, 0, 1, 1], [], []>} : vector<16x1024xbf16>, vector<1024x512xbf16>, vector<16x512xf32> -> vector<16x512xf32>
    %c0_3 = arith.constant 0 : index
    %c0_4 = arith.constant 0 : index
    %3 = vector.load %arg2[%c0_3, %c0_4] : memref<1x896xf32, #tpu.memory_space<vmem>>, vector<1x512xf32>
    %4 = vector.broadcast %3 : vector<1x512xf32> to vector<16x512xf32>
    %5 = arith.addf %2, %4 : vector<16x512xf32>
    %cst_5 = arith.constant 0.000000e+00 : f32
    %6 = vector.broadcast %cst_5 : f32 to vector<16x512xf32>
    %7 = arith.maximumf %5, %6 : vector<16x512xf32>
    %c0_6 = arith.constant 0 : index
    %c0_7 = arith.constant 0 : index
    %8 = vector.load %arg4[%c0_6, %c0_7] : memref<512x256xbf16, #tpu.memory_space<vmem>>, vector<512x256xbf16>
    %9 = arith.extf %8 : vector<512x256xbf16> to vector<512x256xf32>
    %cst_8 = arith.constant dense<0.000000e+00> : vector<16x256xf32>
    %10 = tpu.matmul %7, %9, %cst_8 {dimension_numbers = #tpu.dot_dimension_numbers<[1], [0], [0], [1], [0, 0, 1, 1], [], []>} : vector<16x512xf32>, vector<512x256xf32>, vector<16x256xf32> -> vector<16x256xf32>
    %c0_9 = arith.constant 0 : index
    %c512 = arith.constant 512 : index
    %11 = vector.load %arg2[%c0_9, %c512] : memref<1x896xf32, #tpu.memory_space<vmem>>, vector<1x256xf32>
    %12 = vector.broadcast %11 : vector<1x256xf32> to vector<16x256xf32>
    %13 = arith.addf %10, %12 : vector<16x256xf32>
    %cst_10 = arith.constant 0.000000e+00 : f32
    %14 = vector.broadcast %cst_10 : f32 to vector<16x256xf32>
    %15 = arith.maximumf %13, %14 : vector<16x256xf32>
    %c0_11 = arith.constant 0 : index
    %c0_12 = arith.constant 0 : index
    %16 = vector.load %arg5[%c0_11, %c0_12] : memref<256x128xbf16, #tpu.memory_space<vmem>>, vector<256x128xbf16>
    %17 = arith.extf %16 : vector<256x128xbf16> to vector<256x128xf32>
    %cst_13 = arith.constant dense<0.000000e+00> : vector<16x128xf32>
    %18 = tpu.matmul %15, %17, %cst_13 {dimension_numbers = #tpu.dot_dimension_numbers<[1], [0], [0], [1], [0, 0, 1, 1], [], []>} : vector<16x256xf32>, vector<256x128xf32>, vector<16x128xf32> -> vector<16x128xf32>
    %c0_14 = arith.constant 0 : index
    %c768 = arith.constant 768 : index
    %19 = vector.load %arg2[%c0_14, %c768] : memref<1x896xf32, #tpu.memory_space<vmem>>, vector<1x128xf32>
    %20 = vector.broadcast %19 : vector<1x128xf32> to vector<16x128xf32>
    %21 = arith.addf %18, %20 : vector<16x128xf32>
    %c0_15 = arith.constant 0 : index
    %c0_16 = arith.constant 0 : index
    %22 = vector.load %arg6[%c0_15, %c0_16] : memref<16x128xf32, #tpu.memory_space<vmem>>, vector<16x128xf32>
    tpu.vector_store %arg6[%c0_15, %c0_16], %21 {strides = array<i32>} : memref<16x128xf32, #tpu.memory_space<vmem>>, vector<16x128xf32>,
    return
  }
  func.func @transform_0(%arg0: i32) -> (i32, i32) {
    %c0_i32 = arith.constant 0 : i32
    %c0_i32_0 = arith.constant 0 : i32
    return %arg0, %c0_i32 : i32, i32
  }
  func.func @transform_1(%arg0: i32) -> (i32, i32) {
    %c0_i32 = arith.constant 0 : i32
    %c0_i32_0 = arith.constant 0 : i32
    %c0_i32_1 = arith.constant 0 : i32
    return %c0_i32, %c0_i32_0 : i32, i32
  }
  func.func @transform_2(%arg0: i32) -> (i32, i32) {
    %c0_i32 = arith.constant 0 : i32
    %c0_i32_0 = arith.constant 0 : i32
    %c0_i32_1 = arith.constant 0 : i32
    return %c0_i32, %c0_i32_0 : i32, i32
  }
  func.func @transform_3(%arg0: i32) -> (i32, i32) {
    %c0_i32 = arith.constant 0 : i32
    %c0_i32_0 = arith.constant 0 : i32
    %c0_i32_1 = arith.constant 0 : i32
    return %c0_i32, %c0_i32_0 : i32, i32
  }
  func.func @transform_4(%arg0: i32) -> (i32, i32) {
    %c0_i32 = arith.constant 0 : i32
    %c0_i32_0 = arith.constant 0 : i32
    %c0_i32_1 = arith.constant 0 : i32
    return %c0_i32, %c0_i32_0 : i32, i32
  }
  func.func @transform_5(%arg0: i32) -> (i32, i32) {
    %c0_i32 = arith.constant 0 : i32
    %c0_i32_0 = arith.constant 0 : i32
    return %arg0, %c0_i32 : i32, i32
  }
}

</mosaic_0001>

<bundles_post_ra>
// kernel: tpu_custom_call.1
= control target key start
LH: loop header
LB: loop body
LE: loop exit
PB: predicated region body
PF: predicated region fallthrough
CT: control target
= control target key end

     0   :  { %10 = vsyncpa [#allocation3], 0  ;;  %s4115_s0 = inlined_call_operand.hbm [shape: bf16[16,1024], index: 0, kind: input, shape index: {}]   ;;  %s4116_s1 = inlined_call_operand.hbm [shape: f32[1,896], index: 1, kind: input, shape index: {}]   ;;  %s4117_s2 = inlined_call_operand.hbm [shape: bf16[1024,512], index: 2, kind: input, shape index: {}]   ;;  %s4118_s3 = inlined_call_operand.hbm [shape: bf16[512,256], index: 3, kind: input, shape index: {}]   ;;  %s4119_s4 = inlined_call_operand.hbm [shape: bf16[256,128], index: 4, kind: input, shape index: {}]   ;;  %s4120_s5 = inlined_call_operand.hbm [shape: f32[16,128], index: 5, kind: output, shape index: {}]  }
   0x1   :  { %11 = vsyncpa [#allocation6], 0 }
   0x2   :  { %12 = vsyncpa [#allocation9], 0 }
   0x3   :  { %13 = vsyncpa [#allocation4], 0  ;;  %s3870_s18 = smov [#allocation5]   ;;  %s3871_s20 = smov [#allocation8]  }
   0x4   :  { %s32_s19 = sshll.u32 %s3870_s18, 4  ;;  %s53_s21 = sshll.u32 %s3871_s20, 4  ;;  %s33_s19 = int_to_ptr.vmem [resolvable:$true] %s32_s19  ;;  %s3914_s21 = int_to_ptr.vmem [resolvable:$true] %s53_s21 }
   0x5   :  { %s3730_s24 = scalar_lea.hbm %s4116_s1, 112 }
   0x6   :  { %p3731_p0 = scmp.ne.s32.totalorder %s4116_s1, %s3730_s24  ;;  %p3734_p1 = scmp.lt.u32.totalorder %s3730_s24, %s4116_s1 }
   0x8   :  { %p3736_p2 = pnand %p3734_p1, %p3731_p0 }
   0xa   :  { %3739 = shalt.err (!%p3736_p2)
}
   0xb   :  { %s3740_s29 = scalar_lea.vmem %s33_s19, 112  ;;  %s3744_s30 = scalar_lea.vmem %s33_s19, 128 }
   0xc   :  { %p3741_p3 = scmp.ne.s32.totalorder %s33_s19, %s3740_s29  ;;  %p3745_p4 = scmp.lt.s32.totalorder %s33_s19, %s33_s19 }
   0xd   :  { %p3746_p5 = scmp.lt.s32.totalorder %s3744_s30, %s3740_s29 }
   0xf   :  { %p3747_p6 = por %p3746_p5, %p3745_p4 }
  0x11   :  { %p3748_p7 = pnand %p3747_p6, %p3741_p3 }
  0x13   :  { %3751 = shalt.err (!%p3748_p7)
}
  0x14   :  { %35 = dma.hbm_to_vmem [thread:$0]  %s4116_s1, 112, %s33_s19, [#allocation6]  }
  0x15   :  { %s3752_s10 = scalar_lea.hbm %s4118_s3, 8192 }
  0x16   :  { %p3753_p8 = scmp.ne.s32.totalorder %s4118_s3, %s3752_s10  ;;  %p3756_p9 = scmp.lt.u32.totalorder %s3752_s10, %s4118_s3 }
  0x18   :  { %p3758_p10 = pnand %p3756_p9, %p3753_p8 }
  0x1a   :  { %3761 = shalt.err (!%p3758_p10)
}
  0x1b   :  { %s3762_s15 = scalar_lea.vmem %s3914_s21, 8192  ;;  %p3767_p12 = scmp.lt.s32.totalorder %s3914_s21, %s3914_s21 }
  0x1c   :  { %p3763_p11 = scmp.ne.s32.totalorder %s3914_s21, %s3762_s15  ;;  %p3768_p13 = scmp.lt.s32.totalorder %s3762_s15, %s3762_s15 }
  0x1e   :  { %p3769_p0 = por %p3768_p13, %p3767_p12 }
  0x20   :  { %p3770_p1 = pnand %p3769_p0, %p3763_p11 }
  0x22   :  { %3773 = shalt.err (!%p3770_p1)
}
  0x23   :  { %s3872_s1 = smov 128   ;;  %s3873_s16 = smov 8  }
  0x24   :  { %59 = dma.hbm_to_vmem [thread:$0]  %s4118_s3, 8192, %s3914_s21, [#allocation9], %s3872_s1, %s3872_s1, %s3873_s16  }
  0x25   :  { %s3874_s19 = smov [#allocation2]   ;;  %s3774_s24 = scalar_lea.hbm %s4115_s0, 1024 }
  0x26   :  { %s19_s20 = sshll.u32 %s3874_s19, 4  ;;  %p3775_p2 = scmp.ne.s32.totalorder %s4115_s0, %s3774_s24  ;;  %s20_s20 = int_to_ptr.vmem [resolvable:$true] %s19_s20 }
  0x27   :  { %p3778_p3 = scmp.lt.u32.totalorder %s3774_s24, %s4115_s0 }
  0x29   :  { %p3780_p4 = pnand %p3778_p3, %p3775_p2 }
  0x2b   :  { %3783 = shalt.err (!%p3780_p4)
}
  0x2c   :  { %s3784_s29 = scalar_lea.vmem %s20_s20, 1024  ;;  %p3789_p6 = scmp.lt.s32.totalorder %s20_s20, %s20_s20 }
  0x2d   :  { %p3785_p5 = scmp.ne.s32.totalorder %s20_s20, %s3784_s29  ;;  %p3790_p7 = scmp.lt.s32.totalorder %s3784_s29, %s3784_s29 }
  0x2f   :  { %p3791_p8 = por %p3790_p7, %p3789_p6 }
  0x31   :  { %p3792_p9 = pnand %p3791_p8, %p3785_p5 }
  0x33   :  { %3795 = shalt.err (!%p3792_p9)
}
  0x34   :  { %s3875_s3 = smov 512   ;;  %s3876_s21 = smov 32  }
  0x35   :  { %25 = dma.hbm_to_vmem [thread:$0]  %s4115_s0, 1024, %s20_s20, [#allocation3], %s3875_s3, %s3875_s3, %s3876_s21  }
  0x36   :  { %s3877_s7 = smov [#allocation7]   ;;  %s3796_s11 = scalar_lea.hbm %s4117_s2, 32768 }
  0x37   :  { %s41_s8 = sshll.u32 %s3877_s7, 4  ;;  %p3797_p10 = scmp.ne.s32.totalorder %s4117_s2, %s3796_s11  ;;  %s42_s8 = int_to_ptr.vmem [resolvable:$true] %s41_s8 }
  0x38   :  { %p3800_p11 = scmp.lt.u32.totalorder %s3796_s11, %s4117_s2 }
  0x3a   :  { %p3802_p12 = pnand %p3800_p11, %p3797_p10 }
  0x3c   :  { %3805 = shalt.err (!%p3802_p12)
}
  0x3d   :  { %s3806_s17 = scalar_lea.vmem %s42_s8, 32768  ;;  %p3811_p0 = scmp.lt.s32.totalorder %s42_s8, %s42_s8 }
  0x3e   :  { %p3807_p13 = scmp.ne.s32.totalorder %s42_s8, %s3806_s17  ;;  %p3812_p1 = scmp.lt.s32.totalorder %s3806_s17, %s3806_s17 }
  0x40   :  { %p3813_p2 = por %p3812_p1, %p3811_p0 }
  0x42   :  { %p3814_p3 = pnand %p3813_p2, %p3807_p13 }
  0x44   :  { %3817 = shalt.err (!%p3814_p3)
}
  0x45   :  { %s3878_s0 = smov 256   ;;  %s3879_s18 = smov 16  }
  0x46   :  { %47 = dma.hbm_to_vmem [thread:$0]  %s4117_s2, 32768, %s42_s8, [#allocation6], %s3878_s0, %s3878_s0, %s3879_s18  }
  0x47   :  { %s3880_s22 = smov [#allocation10]   ;;  %s3818_s26 = scalar_lea.hbm %s4119_s4, 2048 }
  0x48   :  { %s65_s23 = sshll.u32 %s3880_s22, 4  ;;  %p3819_p4 = scmp.ne.s32.totalorder %s4119_s4, %s3818_s26  ;;  %s66_s23 = int_to_ptr.vmem [resolvable:$true] %s65_s23 }
  0x49   :  { %p3822_p5 = scmp.lt.u32.totalorder %s3818_s26, %s4119_s4 }
  0x4b   :  { %p3824_p6 = pnand %p3822_p5, %p3819_p4 }
  0x4d   :  { %3827 = shalt.err (!%p3824_p6)
}
  0x4e   :  { %s3828_s21 = scalar_lea.vmem %s66_s23, 2048  ;;  %p3833_p8 = scmp.lt.s32.totalorder %s66_s23, %s66_s23 }
  0x4f   :  { %p3829_p7 = scmp.ne.s32.totalorder %s66_s23, %s3828_s21  ;;  %p3834_p9 = scmp.lt.s32.totalorder %s3828_s21, %s3828_s21 }
  0x51   :  { %p3835_p10 = por %p3834_p9, %p3833_p8 }
  0x53   :  { %p3836_p11 = pnand %p3835_p10, %p3829_p7 }
  0x55   :  { %3839 = shalt.err (!%p3836_p11)
}
  0x56   :  { %s3881_s2 = smov 64   ;;  %s3882_s30 = smov 4  }
  0x57   :  { %71 = dma.hbm_to_vmem [thread:$0]  %s4119_s4, 2048, %s66_s23, [#allocation9], %s3881_s2, %s3881_s2, %s3882_s30  }
  0x58   :  { %3862 = dma.done.wait [#allocation3], 1024  }
  0x59   :  { %3863 = vsyncadd [#allocation3], 4294966272 }
  0x5a   :  { %3864 = dma.done.wait [#allocation6], 32880  }
  0x5b   :  { %3865 = vsyncadd [#allocation6], 4294934416 }
  0x5c   :  { %3866 = dma.done.wait [#allocation9], 10240  }
  0x5d   :  { %3867 = vsyncadd [#allocation9], 4294957056  ;;  %v3250_v0 = vld [vmem:[#allocation7 + $0x4] ss:$16 sps:$4 sm:$0xff]   ;;  %v3254_v2 = vld [vmem:[#allocation7] ss:$16 sps:$4 sm:$0xff]  }
  0x5e   :  { %v3252_v1 = vld [vmem:[#allocation7 + $0x204] ss:$16 sps:$4 sm:$0xff]   ;;  %1693 = vmatprep.subr.bf16.mxu1 %v3250_v0  ;;  %v3255_v3 = vld [vmem:[#allocation7 + $0x200] ss:$16 sps:$4 sm:$0xff]   ;;  %v87_v48 = vld [vmem:[#allocation2] sm:$0xff]  ;;  %s3883_s4 = smov [#allocation11]  }
  0x5f   :  { %1736 = vmatprep.subr.bf16.mxu0 %v3252_v1  ;;  %v3256_v4 = vld [vmem:[#allocation7 + $0x24] ss:$16 sps:$4 sm:$0xff]   ;;  %1694 = vmatpush1.bf16.msra.mxu1 %v3254_v2  ;;  %v3260_v6 = vld [vmem:[#allocation7 + $0x20] ss:$16 sps:$4 sm:$0xff]   ;;  %v91_v49 = vld [vmem:[#allocation2 + $0x20] sm:$0xff]  ;;  %s2560_s8 = sshll.u32 %s3883_s4, 4  ;;  %s2561_s8 = int_to_ptr.vmem [resolvable:$true] %s2560_s8 }
  0x60   :  { %1737 = vmatpush1.bf16.msra.mxu0 %v3255_v3  ;;  %v3258_v5 = vld [vmem:[#allocation7 + $0x224] ss:$16 sps:$4 sm:$0xff]   ;;  %1695 = vmatprep.subr.bf16.mxu1 %v3256_v4  ;;  %v3261_v7 = vld [vmem:[#allocation7 + $0x220] ss:$16 sps:$4 sm:$0xff]   ;;  %v2575_v53 = vcombine.high %v87_v48, %v91_v49  ;;  %s3840_s9 = scalar_lea.vmem %s2561_s8, 256  ;;  %p3845_p13 = scmp.lt.s32.totalorder %s2561_s8, %s2561_s8 }
  0x61   :  { %1738 = vmatprep.subr.bf16.mxu0 %v3258_v5  ;;  %v3262_v8 = vld [vmem:[#allocation7 + $0x44] ss:$16 sps:$4 sm:$0xff]   ;;  %v3266_v10 = vld [vmem:[#allocation7 + $0x40] ss:$16 sps:$4 sm:$0xff]   ;;  %p3841_p12 = scmp.ne.s32.totalorder %s2561_s8, %s3840_s9  ;;  %p3846_p0 = scmp.lt.s32.totalorder %s3840_s9, %s3840_s9 }
  0x62   :  { %v3264_v9 = vld [vmem:[#allocation7 + $0x244] ss:$16 sps:$4 sm:$0xff]   ;;  %v3267_v11 = vld [vmem:[#allocation7 + $0x240] ss:$16 sps:$4 sm:$0xff]   ;;  %1725 = vmatprep.mubr.bf16.mxu1 %v2575_v53 }
  0x63   :  { %1696 = vmatpush1.bf16.msra.mxu1 %v3260_v6  ;;  %v3268_v12 = vld [vmem:[#allocation7 + $0x64] ss:$16 sps:$4 sm:$0xff]   ;;  %v3272_v14 = vld [vmem:[#allocation7 + $0x60] ss:$16 sps:$4 sm:$0xff]   ;;  %p3847_p1 = por %p3846_p0, %p3845_p13 }
  0x64   :  { %1739 = vmatpush1.bf16.msra.mxu0 %v3261_v7  ;;  %1697 = vmatprep.subr.bf16.mxu1 %v3262_v8  ;;  %v3270_v13 = vld [vmem:[#allocation7 + $0x264] ss:$16 sps:$4 sm:$0xff]   ;;  %v3273_v15 = vld [vmem:[#allocation7 + $0x260] ss:$16 sps:$4 sm:$0xff]   ;;  %v3351_v7 = vld [vmem:[#allocation7 + $0xc] ss:$16 sps:$4 sm:$0xff]   ;;  %v3987_v8 = vcombine.low %v87_v48, %v91_v49 }
  0x65   :  { %1740 = vmatprep.subr.bf16.mxu0 %v3264_v9  ;;  %v3274_v16 = vld [vmem:[#allocation7 + $0x84] ss:$16 sps:$4 sm:$0xff]   ;;  %v3278_v18 = vld [vmem:[#allocation7 + $0x80] ss:$16 sps:$4 sm:$0xff]   ;;  %v3405_v48 = vld [vmem:[#allocation7 + $0x12c] ss:$16 sps:$4 sm:$0xff]   ;;  %p3848_p2 = pnand %p3847_p1, %p3841_p12 }
  0x66   :  { %v3276_v17 = vld [vmem:[#allocation7 + $0x284] ss:$16 sps:$4 sm:$0xff]   ;;  %v3279_v19 = vld [vmem:[#allocation7 + $0x280] ss:$16 sps:$4 sm:$0xff]  }
  0x67   :  { %1698 = vmatpush1.bf16.msra.mxu1 %v3266_v10  ;;  %v3280_v20 = vld [vmem:[#allocation7 + $0xa4] ss:$16 sps:$4 sm:$0xff]   ;;  %v3284_v22 = vld [vmem:[#allocation7 + $0xa0] ss:$16 sps:$4 sm:$0xff]  }
  0x68   :  { %1741 = vmatpush1.bf16.msra.mxu0 %v3267_v11  ;;  %1699 = vmatprep.subr.bf16.mxu1 %v3268_v12  ;;  %v3282_v21 = vld [vmem:[#allocation7 + $0x2a4] ss:$16 sps:$4 sm:$0xff]   ;;  %v3285_v23 = vld [vmem:[#allocation7 + $0x2a0] ss:$16 sps:$4 sm:$0xff]   ;;  %v3349_v11 = vld [vmem:[#allocation7 + $0x8] ss:$16 sps:$4 sm:$0xff]  }
  0x69   :  { %1742 = vmatprep.subr.bf16.mxu0 %v3270_v13  ;;  %v3286_v24 = vld [vmem:[#allocation7 + $0xc4] ss:$16 sps:$4 sm:$0xff]   ;;  %v3290_v26 = vld [vmem:[#allocation7 + $0xc0] ss:$16 sps:$4 sm:$0xff]   ;;  %v3357_v13 = vld [vmem:[#allocation7 + $0x2c] ss:$16 sps:$4 sm:$0xff]  }
  0x6a   :  { %v3288_v25 = vld [vmem:[#allocation7 + $0x2c4] ss:$16 sps:$4 sm:$0xff]   ;;  %v3291_v27 = vld [vmem:[#allocation7 + $0x2c0] ss:$16 sps:$4 sm:$0xff]  }
  0x6b   :  { %1700 = vmatpush1.bf16.msra.mxu1 %v3272_v14  ;;  %v3292_v28 = vld [vmem:[#allocation7 + $0xe4] ss:$16 sps:$4 sm:$0xff]   ;;  %v3296_v30 = vld [vmem:[#allocation7 + $0xe0] ss:$16 sps:$4 sm:$0xff]  }
  0x6c   :  { %1743 = vmatpush1.bf16.msra.mxu0 %v3273_v15  ;;  %1701 = vmatprep.subr.bf16.mxu1 %v3274_v16  ;;  %v3294_v29 = vld [vmem:[#allocation7 + $0x2e4] ss:$16 sps:$4 sm:$0xff]   ;;  %v3297_v31 = vld [vmem:[#allocation7 + $0x2e0] ss:$16 sps:$4 sm:$0xff]   ;;  %v3355_v15 = vld [vmem:[#allocation7 + $0x28] ss:$16 sps:$4 sm:$0xff]  }
  0x6d   :  { %1744 = vmatprep.subr.bf16.mxu0 %v3276_v17  ;;  %v3298_v32 = vld [vmem:[#allocation7 + $0x104] ss:$16 sps:$4 sm:$0xff]   ;;  %v3302_v34 = vld [vmem:[#allocation7 + $0x100] ss:$16 sps:$4 sm:$0xff]   ;;  %v3363_v17 = vld [vmem:[#allocation7 + $0x4c] ss:$16 sps:$4 sm:$0xff]  }
  0x6e   :  { %v3300_v33 = vld [vmem:[#allocation7 + $0x304] ss:$16 sps:$4 sm:$0xff]   ;;  %v3303_v35 = vld [vmem:[#allocation7 + $0x300] ss:$16 sps:$4 sm:$0xff]  }
  0x6f   :  { %1702 = vmatpush1.bf16.msra.mxu1 %v3278_v18  ;;  %v3304_v36 = vld [vmem:[#allocation7 + $0x124] ss:$16 sps:$4 sm:$0xff]   ;;  %v3308_v38 = vld [vmem:[#allocation7 + $0x120] ss:$16 sps:$4 sm:$0xff]  }
  0x70   :  { %1745 = vmatpush1.bf16.msra.mxu0 %v3279_v19  ;;  %1703 = vmatprep.subr.bf16.mxu1 %v3280_v20  ;;  %v3306_v37 = vld [vmem:[#allocation7 + $0x324] ss:$16 sps:$4 sm:$0xff]   ;;  %v3309_v39 = vld [vmem:[#allocation7 + $0x320] ss:$16 sps:$4 sm:$0xff]   ;;  %v3361_v19 = vld [vmem:[#allocation7 + $0x48] ss:$16 sps:$4 sm:$0xff]  }
  0x71   :  { %1746 = vmatprep.subr.bf16.mxu0 %v3282_v21  ;;  %v3310_v40 = vld [vmem:[#allocation7 + $0x144] ss:$16 sps:$4 sm:$0xff]   ;;  %v3314_v42 = vld [vmem:[#allocation7 + $0x140] ss:$16 sps:$4 sm:$0xff]   ;;  %v3369_v21 = vld [vmem:[#allocation7 + $0x6c] ss:$16 sps:$4 sm:$0xff]  }
  0x72   :  { %v3312_v41 = vld [vmem:[#allocation7 + $0x344] ss:$16 sps:$4 sm:$0xff]   ;;  %v3315_v43 = vld [vmem:[#allocation7 + $0x340] ss:$16 sps:$4 sm:$0xff]  }
  0x73   :  { %1704 = vmatpush1.bf16.msra.mxu1 %v3284_v22  ;;  %v3316_v44 = vld [vmem:[#allocation7 + $0x164] ss:$16 sps:$4 sm:$0xff]   ;;  %v3320_v46 = vld [vmem:[#allocation7 + $0x160] ss:$16 sps:$4 sm:$0xff]  }
  0x74   :  { %1747 = vmatpush1.bf16.msra.mxu0 %v3285_v23  ;;  %1705 = vmatprep.subr.bf16.mxu1 %v3286_v24  ;;  %v3318_v45 = vld [vmem:[#allocation7 + $0x364] ss:$16 sps:$4 sm:$0xff]   ;;  %v3321_v47 = vld [vmem:[#allocation7 + $0x360] ss:$16 sps:$4 sm:$0xff]   ;;  %v3367_v23 = vld [vmem:[#allocation7 + $0x68] ss:$16 sps:$4 sm:$0xff]  }
  0x75   :  { %1748 = vmatprep.subr.bf16.mxu0 %v3288_v25  ;;  %v88_v50 = vld [vmem:[#allocation2 + $0x8] sm:$0xff]  ;;  %v3375_v25 = vld [vmem:[#allocation7 + $0x8c] ss:$16 sps:$4 sm:$0xff]  }
  0x76   :  { %v92_v51 = vld [vmem:[#allocation2 + $0x28] sm:$0xff] }
  0x77   :  { %1706 = vmatpush1.bf16.msra.mxu1 %v3290_v26  ;;  %v3322_v52 = vld [vmem:[#allocation7 + $0x184] ss:$16 sps:$4 sm:$0xff]   ;;  %v3984_v55 = vcombine.high %v88_v50, %v92_v51  ;;  %v3326_v56 = vld [vmem:[#allocation7 + $0x180] ss:$16 sps:$4 sm:$0xff]   ;;  %v3989_v9 = vcombine.low %v88_v50, %v92_v51  ;;  %v3403_v50 = vld [vmem:[#allocation7 + $0x128] ss:$16 sps:$4 sm:$0xff]  }
  0x78   :  { %1749 = vmatpush1.bf16.msra.mxu0 %v3291_v27  ;;  %1707 = vmatprep.subr.bf16.mxu1 %v3292_v28  ;;  %v3324_v54 = vld [vmem:[#allocation7 + $0x384] ss:$16 sps:$4 sm:$0xff]   ;;  %v3327_v57 = vld [vmem:[#allocation7 + $0x380] ss:$16 sps:$4 sm:$0xff]   ;;  %v3373_v27 = vld [vmem:[#allocation7 + $0x88] ss:$16 sps:$4 sm:$0xff]  }
  0x79   :  { %1750 = vmatprep.subr.bf16.mxu0 %v3294_v29  ;;  %1768 = vmatprep.mubr.bf16.mxu0 %v3984_v55  ;;  %v3328_v58 = vld [vmem:[#allocation7 + $0x1a4] ss:$16 sps:$4 sm:$0xff]   ;;  %v3332_v60 = vld [vmem:[#allocation7 + $0x1a0] ss:$16 sps:$4 sm:$0xff]   ;;  %v3381_v29 = vld [vmem:[#allocation7 + $0xac] ss:$16 sps:$4 sm:$0xff]  }
  0x7a   :  { %v3330_v59 = vld [vmem:[#allocation7 + $0x3a4] ss:$16 sps:$4 sm:$0xff]   ;;  %v3333_v61 = vld [vmem:[#allocation7 + $0x3a0] ss:$16 sps:$4 sm:$0xff]  }
  0x7b   :  { %1708 = vmatpush1.bf16.msra.mxu1 %v3296_v30  ;;  %v3334_v62 = vld [vmem:[#allocation7 + $0x1c4] ss:$16 sps:$4 sm:$0xff]   ;;  %v3338_v0 = vld [vmem:[#allocation7 + $0x1c0] ss:$16 sps:$4 sm:$0xff]  }
  0x7c   :  { %1751 = vmatpush1.bf16.msra.mxu0 %v3297_v31  ;;  %1709 = vmatprep.subr.bf16.mxu1 %v3298_v32  ;;  %v3336_v63 = vld [vmem:[#allocation7 + $0x3c4] ss:$16 sps:$4 sm:$0xff]   ;;  %v3339_v1 = vld [vmem:[#allocation7 + $0x3c0] ss:$16 sps:$4 sm:$0xff]   ;;  %v3379_v31 = vld [vmem:[#allocation7 + $0xa8] ss:$16 sps:$4 sm:$0xff]  }
  0x7d   :  { %1752 = vmatprep.subr.bf16.mxu0 %v3300_v33  ;;  %v3340_v2 = vld [vmem:[#allocation7 + $0x1e4] ss:$16 sps:$4 sm:$0xff]   ;;  %v3344_v4 = vld [vmem:[#allocation7 + $0x1e0] ss:$16 sps:$4 sm:$0xff]   ;;  %v3387_v33 = vld [vmem:[#allocation7 + $0xcc] ss:$16 sps:$4 sm:$0xff]  }
  0x7e   :  { %v3342_v3 = vld [vmem:[#allocation7 + $0x3e4] ss:$16 sps:$4 sm:$0xff]   ;;  %v3345_v5 = vld [vmem:[#allocation7 + $0x3e0] ss:$16 sps:$4 sm:$0xff]  }
  0x7f   :  { %1710 = vmatpush1.bf16.msra.mxu1 %v3302_v34  ;;  %v3348_v6 = vld [vmem:[#allocation7 + $0x404] ss:$16 sps:$4 sm:$0xff]   ;;  %v3346_v10 = vld [vmem:[#allocation7 + $0x400] ss:$16 sps:$4 sm:$0xff]   ;;  %v3993_v34 = vld [vmem:[#allocation2 + $0x10] sm:$0xff] }
  0x80   :  { %1753 = vmatpush1.bf16.msra.mxu0 %v3303_v35  ;;  %1711 = vmatprep.subr.bf16.mxu1 %v3304_v36  ;;  %v3354_v12 = vld [vmem:[#allocation7 + $0x424] ss:$16 sps:$4 sm:$0xff]   ;;  %v3352_v14 = vld [vmem:[#allocation7 + $0x420] ss:$16 sps:$4 sm:$0xff]   ;;  %v3995_v35 = vld [vmem:[#allocation2 + $0x30] sm:$0xff] }
  0x81   :  { %1754 = vmatprep.subr.bf16.mxu0 %v3306_v37  ;;  %v3360_v16 = vld [vmem:[#allocation7 + $0x444] ss:$16 sps:$4 sm:$0xff]   ;;  %v3358_v18 = vld [vmem:[#allocation7 + $0x440] ss:$16 sps:$4 sm:$0xff]   ;;  %v3385_v37 = vld [vmem:[#allocation7 + $0xc8] ss:$16 sps:$4 sm:$0xff]  }
  0x82   :  { %v3366_v20 = vld [vmem:[#allocation7 + $0x464] ss:$16 sps:$4 sm:$0xff]   ;;  %v3364_v22 = vld [vmem:[#allocation7 + $0x460] ss:$16 sps:$4 sm:$0xff]  }
  0x83   :  { %1712 = vmatpush1.bf16.msra.mxu1 %v3308_v38  ;;  %v3372_v24 = vld [vmem:[#allocation7 + $0x484] ss:$16 sps:$4 sm:$0xff]   ;;  %v3370_v26 = vld [vmem:[#allocation7 + $0x480] ss:$16 sps:$4 sm:$0xff]   ;;  %v3999_v38 = vcombine.high %v3993_v34, %v3995_v35 }
  0x84   :  { %1755 = vmatpush1.bf16.msra.mxu0 %v3309_v39  ;;  %1713 = vmatprep.subr.bf16.mxu1 %v3310_v40  ;;  %v3378_v28 = vld [vmem:[#allocation7 + $0x4a4] ss:$16 sps:$4 sm:$0xff]   ;;  %v3376_v30 = vld [vmem:[#allocation7 + $0x4a0] ss:$16 sps:$4 sm:$0xff]   ;;  %v3393_v40 = vld [vmem:[#allocation7 + $0xec] ss:$16 sps:$4 sm:$0xff]  }
  0x85   :  { %1756 = vmatprep.subr.bf16.mxu0 %v3312_v41  ;;  %v3384_v32 = vld [vmem:[#allocation7 + $0x4c4] ss:$16 sps:$4 sm:$0xff]   ;;  %v3382_v36 = vld [vmem:[#allocation7 + $0x4c0] ss:$16 sps:$4 sm:$0xff]  }
  0x86   :  { %v3390_v39 = vld [vmem:[#allocation7 + $0x4e4] ss:$16 sps:$4 sm:$0xff]   ;;  %v3388_v41 = vld [vmem:[#allocation7 + $0x4e0] ss:$16 sps:$4 sm:$0xff]  }
  0x87   :  { %1714 = vmatpush1.bf16.msra.mxu1 %v3314_v42  ;;  %v3391_v42 = vld [vmem:[#allocation7 + $0xe8] ss:$16 sps:$4 sm:$0xff]   ;;  %v3400_v49 = vld [vmem:[#allocation7 + $0x520] ss:$16 sps:$4 sm:$0xff]   ;;  %v3408_v51 = vld [vmem:[#allocation7 + $0x544] ss:$16 sps:$4 sm:$0xff]  }
  0x88   :  { %1757 = vmatpush1.bf16.msra.mxu0 %v3315_v43  ;;  %1715 = vmatprep.subr.bf16.mxu1 %v3316_v44  ;;  %v3396_v43 = vld [vmem:[#allocation7 + $0x504] ss:$16 sps:$4 sm:$0xff]   ;;  %v3399_v44 = vld [vmem:[#allocation7 + $0x10c] ss:$16 sps:$4 sm:$0xff]  }
  0x89   :  { %1758 = vmatprep.subr.bf16.mxu0 %v3318_v45  ;;  %v3394_v45 = vld [vmem:[#allocation7 + $0x500] ss:$16 sps:$4 sm:$0xff]  }
  0x8b   :  { %1716 = vmatpush1.bf16.msra.mxu1 %v3320_v46  ;;  %v3397_v46 = vld [vmem:[#allocation7 + $0x108] ss:$16 sps:$4 sm:$0xff]  }
  0x8c   :  { %1759 = vmatpush1.bf16.msra.mxu0 %v3321_v47  ;;  %1717 = vmatprep.subr.bf16.mxu1 %v3322_v52  ;;  %v3402_v47 = vld [vmem:[#allocation7 + $0x524] ss:$16 sps:$4 sm:$0xff]   ;;  %v3411_v52 = vld [vmem:[#allocation7 + $0x14c] ss:$16 sps:$4 sm:$0xff]  }
  0x8d   :  { %1760 = vmatprep.subr.bf16.mxu0 %v3324_v54  ;;  %v3409_v54 = vld [vmem:[#allocation7 + $0x148] ss:$16 sps:$4 sm:$0xff]  }
  0x8f   :  { %1718 = vmatpush1.bf16.msra.mxu1 %v3326_v56  ;;  %v3414_v56 = vld [vmem:[#allocation7 + $0x564] ss:$16 sps:$4 sm:$0xff]  }
  0x90   :  { %1761 = vmatpush1.bf16.msra.mxu0 %v3327_v57  ;;  %1719 = vmatprep.subr.bf16.mxu1 %v3328_v58  ;;  %v3417_v57 = vld [vmem:[#allocation7 + $0x16c] ss:$16 sps:$4 sm:$0xff]   ;;  %v3412_v58 = vld [vmem:[#allocation7 + $0x560] ss:$16 sps:$4 sm:$0xff]  }
  0x91   :  { %1762 = vmatprep.subr.bf16.mxu0 %v3330_v59  ;;  %v3415_v59 = vld [vmem:[#allocation7 + $0x168] ss:$16 sps:$4 sm:$0xff]  }
  0x93   :  { %1720 = vmatpush1.bf16.msra.mxu1 %v3332_v60  ;;  %v3420_v60 = vld [vmem:[#allocation7 + $0x584] ss:$16 sps:$4 sm:$0xff]  }
  0x94   :  { %1763 = vmatpush1.bf16.msra.mxu0 %v3333_v61  ;;  %1721 = vmatprep.subr.bf16.mxu1 %v3334_v62  ;;  %v3423_v61 = vld [vmem:[#allocation7 + $0x18c] ss:$16 sps:$4 sm:$0xff]   ;;  %v3418_v62 = vld [vmem:[#allocation7 + $0x580] ss:$16 sps:$4 sm:$0xff]  }
  0x95   :  { %1764 = vmatprep.subr.bf16.mxu0 %v3336_v63  ;;  %v3421_v63 = vld [vmem:[#allocation7 + $0x188] ss:$16 sps:$4 sm:$0xff]  }
  0x97   :  { %1722 = vmatpush1.bf16.msra.mxu1 %v3338_v0  ;;  %v3426_v0 = vld [vmem:[#allocation7 + $0x5a4] ss:$16 sps:$4 sm:$0xff]  }
  0x98   :  { %1765 = vmatpush1.bf16.msra.mxu0 %v3339_v1  ;;  %1723 = vmatprep.subr.bf16.mxu1 %v3340_v2  ;;  %v3429_v1 = vld [vmem:[#allocation7 + $0x1ac] ss:$16 sps:$4 sm:$0xff]   ;;  %v3424_v2 = vld [vmem:[#allocation7 + $0x5a0] ss:$16 sps:$4 sm:$0xff]  }
  0x99   :  { %1766 = vmatprep.subr.bf16.mxu0 %v3342_v3  ;;  %v3427_v3 = vld [vmem:[#allocation7 + $0x1a8] ss:$16 sps:$4 sm:$0xff]  }
  0x9b   :  { %1724 = vmatpush1.bf16.msra.mxu1 %v3344_v4  ;;  %v3432_v4 = vld [vmem:[#allocation7 + $0x5c4] ss:$16 sps:$4 sm:$0xff]  }
  0x9c   :  { %1767 = vmatpush1.bf16.msra.mxu0 %v3345_v5  ;;  %1865 = vmatprep.subr.bf16.mxu1 %v3351_v7  ;;  %v3435_v5 = vld [vmem:[#allocation7 + $0x1cc] ss:$16 sps:$4 sm:$0xff]   ;;  %v3433_v7 = vld [vmem:[#allocation7 + $0x1c8] ss:$16 sps:$4 sm:$0xff]  }
  0x9d   :  { %1779 = vmatprep.subr.bf16.mxu0 %v3348_v6  ;;  %v3430_v6 = vld [vmem:[#allocation7 + $0x5c0] ss:$16 sps:$4 sm:$0xff]  }
  0x9e   :  { %1726 = vmatmul.mubr.bf16.vlgmr.msra.gmra.mrb[0].mxu1 %v3987_v8 }
  0x9f   :  { %1769 = vmatmul.mubr.bf16.vlgmr.msra.gmra.mrb[0].mxu0 %v3989_v9  ;;  %1866 = vmatpush1.bf16.msra.mxu1 %v3349_v11  ;;  %v3441_v11 = vld [vmem:[#allocation7 + $0x1ec] ss:$16 sps:$4 sm:$0xff]  }
  0xa0   :  { %1780 = vmatpush1.bf16.msra.mxu0 %v3346_v10  ;;  %1867 = vmatprep.subr.bf16.mxu1 %v3357_v13  ;;  %v3438_v10 = vld [vmem:[#allocation7 + $0x5e4] ss:$16 sps:$4 sm:$0xff]   ;;  %v3439_v13 = vld [vmem:[#allocation7 + $0x1e8] ss:$16 sps:$4 sm:$0xff]  }
  0xa1   :  { %1781 = vmatprep.subr.bf16.mxu0 %v3354_v12  ;;  %1897 = vmatprep.mubr.bf16.mxu1 %v2575_v53  ;;  %v3406_v53 = vld [vmem:[#allocation7 + $0x540] ss:$16 sps:$4 sm:$0xff]  }
  0xa2   :  { %1811 = vmatprep.mubr.bf16.mxu0 %v3999_v38  ;;  %v3436_v12 = vld [vmem:[#allocation7 + $0x5e0] ss:$16 sps:$4 sm:$0xff]  }
  0xa3   :  { %1868 = vmatpush1.bf16.msra.mxu1 %v3355_v15  ;;  %v3447_v15 = vld [vmem:[#allocation7 + $0x20c] ss:$16 sps:$4 sm:$0xff]  }
  0xa4   :  { %1782 = vmatpush1.bf16.msra.mxu0 %v3352_v14  ;;  %1869 = vmatprep.subr.bf16.mxu1 %v3363_v17  ;;  %v3444_v14 = vld [vmem:[#allocation7 + $0x604] ss:$16 sps:$4 sm:$0xff]   ;;  %v3442_v17 = vld [vmem:[#allocation7 + $0x600] ss:$16 sps:$4 sm:$0xff]  }
  0xa5   :  { %1783 = vmatprep.subr.bf16.mxu0 %v3360_v16  ;;  %v4004_v16 = vcombine.low %v3993_v34, %v3995_v35  ;;  %v3471_v34 = vld [vmem:[#allocation7 + $0x28c] ss:$16 sps:$4 sm:$0xff]   ;;  %v3466_v35 = vld [vmem:[#allocation7 + $0x680] ss:$16 sps:$4 sm:$0xff]  }
  0xa7   :  { %1870 = vmatpush1.bf16.msra.mxu1 %v3361_v19  ;;  %v3450_v19 = vld [vmem:[#allocation7 + $0x624] ss:$16 sps:$4 sm:$0xff]  }
  0xa8   :  { %1784 = vmatpush1.bf16.msra.mxu0 %v3358_v18  ;;  %1871 = vmatprep.subr.bf16.mxu1 %v3369_v21  ;;  %v3445_v18 = vld [vmem:[#allocation7 + $0x208] ss:$16 sps:$4 sm:$0xff]   ;;  %v4006_v21 = vld [vmem:[#allocation2 + $0x18] sm:$0xff] }
  0xa9   :  { %1785 = vmatprep.subr.bf16.mxu0 %v3366_v20  ;;  %v3453_v20 = vld [vmem:[#allocation7 + $0x22c] ss:$16 sps:$4 sm:$0xff]  }
  0xab   :  { %1872 = vmatpush1.bf16.msra.mxu1 %v3367_v23  ;;  %v3448_v23 = vld [vmem:[#allocation7 + $0x620] ss:$16 sps:$4 sm:$0xff]  }
  0xac   :  { %1786 = vmatpush1.bf16.msra.mxu0 %v3364_v22  ;;  %1873 = vmatprep.subr.bf16.mxu1 %v3375_v25  ;;  %v4008_v22 = vld [vmem:[#allocation2 + $0x38] sm:$0xff] }
  0xad   :  { %1787 = vmatprep.subr.bf16.mxu0 %v3372_v24  ;;  %v3451_v24 = vld [vmem:[#allocation7 + $0x228] ss:$16 sps:$4 sm:$0xff]   ;;  %v4014_v25 = vcombine.high %v4006_v21, %v4008_v22 }
  0xaf   :  { %1874 = vmatpush1.bf16.msra.mxu1 %v3373_v27  ;;  %v3459_v27 = vld [vmem:[#allocation7 + $0x24c] ss:$16 sps:$4 sm:$0xff]  }
  0xb0   :  { %1788 = vmatpush1.bf16.msra.mxu0 %v3370_v26  ;;  %1875 = vmatprep.subr.bf16.mxu1 %v3381_v29  ;;  %v3456_v26 = vld [vmem:[#allocation7 + $0x644] ss:$16 sps:$4 sm:$0xff]   ;;  %v3457_v29 = vld [vmem:[#allocation7 + $0x248] ss:$16 sps:$4 sm:$0xff]  }
  0xb1   :  { %1789 = vmatprep.subr.bf16.mxu0 %v3378_v28  ;;  %v3454_v28 = vld [vmem:[#allocation7 + $0x640] ss:$16 sps:$4 sm:$0xff]  }
  0xb3   :  { %1876 = vmatpush1.bf16.msra.mxu1 %v3379_v31  ;;  %v3460_v31 = vld [vmem:[#allocation7 + $0x660] ss:$16 sps:$4 sm:$0xff]  }
  0xb4   :  { %1790 = vmatpush1.bf16.msra.mxu0 %v3376_v30  ;;  %1877 = vmatprep.subr.bf16.mxu1 %v3387_v33  ;;  %v3465_v30 = vld [vmem:[#allocation7 + $0x26c] ss:$16 sps:$4 sm:$0xff]   ;;  %v3468_v33 = vld [vmem:[#allocation7 + $0x684] ss:$16 sps:$4 sm:$0xff]  }
  0xb5   :  { %1791 = vmatprep.subr.bf16.mxu0 %v3384_v32  ;;  %v3463_v32 = vld [vmem:[#allocation7 + $0x268] ss:$16 sps:$4 sm:$0xff]  }
  0xb7   :  { %1878 = vmatpush1.bf16.msra.mxu1 %v3385_v37  ;;  %v3477_v37 = vld [vmem:[#allocation7 + $0x2ac] ss:$16 sps:$4 sm:$0xff]  }
  0xb8   :  { %1792 = vmatpush1.bf16.msra.mxu0 %v3382_v36  ;;  %1879 = vmatprep.subr.bf16.mxu1 %v3393_v40  ;;  %v3469_v36 = vld [vmem:[#allocation7 + $0x288] ss:$16 sps:$4 sm:$0xff]  }
  0xb9   :  { %1793 = vmatprep.subr.bf16.mxu0 %v3390_v39  ;;  %v3472_v39 = vld [vmem:[#allocation7 + $0x6a0] ss:$16 sps:$4 sm:$0xff]   ;;  %v3475_v40 = vld [vmem:[#allocation7 + $0x2a8] ss:$16 sps:$4 sm:$0xff]  }
  0xbb   :  { %1880 = vmatpush1.bf16.msra.mxu1 %v3391_v42  ;;  %v3483_v42 = vld [vmem:[#allocation7 + $0x2cc] ss:$16 sps:$4 sm:$0xff]  }
  0xbc   :  { %1794 = vmatpush1.bf16.msra.mxu0 %v3388_v41  ;;  %1881 = vmatprep.subr.bf16.mxu1 %v3399_v44  ;;  %v3480_v41 = vld [vmem:[#allocation7 + $0x6c4] ss:$16 sps:$4 sm:$0xff]   ;;  %v3481_v44 = vld [vmem:[#allocation7 + $0x2c8] ss:$16 sps:$4 sm:$0xff]  }
  0xbd   :  { %1795 = vmatprep.subr.bf16.mxu0 %v3396_v43  ;;  %v3478_v43 = vld [vmem:[#allocation7 + $0x6c0] ss:$16 sps:$4 sm:$0xff]  }
  0xbf   :  { %1882 = vmatpush1.bf16.msra.mxu1 %v3397_v46  ;;  %v3489_v46 = vld [vmem:[#allocation7 + $0x2ec] ss:$16 sps:$4 sm:$0xff]  }
  0xc0   :  { %1796 = vmatpush1.bf16.msra.mxu0 %v3394_v45  ;;  %1883 = vmatprep.subr.bf16.mxu1 %v3405_v48  ;;  %v3486_v45 = vld [vmem:[#allocation7 + $0x6e4] ss:$16 sps:$4 sm:$0xff]   ;;  %v3487_v48 = vld [vmem:[#allocation7 + $0x2e8] ss:$16 sps:$4 sm:$0xff]  }
  0xc1   :  { %1797 = vmatprep.subr.bf16.mxu0 %v3402_v47  ;;  %v3484_v47 = vld [vmem:[#allocation7 + $0x6e0] ss:$16 sps:$4 sm:$0xff]  }
  0xc3   :  { %1884 = vmatpush1.bf16.msra.mxu1 %v3403_v50  ;;  %v3495_v50 = vld [vmem:[#allocation7 + $0x30c] ss:$16 sps:$4 sm:$0xff]  }
  0xc4   :  { %1798 = vmatpush1.bf16.msra.mxu0 %v3400_v49  ;;  %1885 = vmatprep.subr.bf16.mxu1 %v3411_v52  ;;  %v3492_v49 = vld [vmem:[#allocation7 + $0x704] ss:$16 sps:$4 sm:$0xff]   ;;  %v3493_v52 = vld [vmem:[#allocation7 + $0x308] ss:$16 sps:$4 sm:$0xff]  }
  0xc5   :  { %1799 = vmatprep.subr.bf16.mxu0 %v3408_v51  ;;  %v3490_v51 = vld [vmem:[#allocation7 + $0x700] ss:$16 sps:$4 sm:$0xff]  }
  0xc7   :  { %1886 = vmatpush1.bf16.msra.mxu1 %v3409_v54  ;;  %v3501_v54 = vld [vmem:[#allocation7 + $0x32c] ss:$16 sps:$4 sm:$0xff]  }
  0xc8   :  { %1800 = vmatpush1.bf16.msra.mxu0 %v3406_v53  ;;  %1887 = vmatprep.subr.bf16.mxu1 %v3417_v57  ;;  %v3498_v53 = vld [vmem:[#allocation7 + $0x724] ss:$16 sps:$4 sm:$0xff]   ;;  %v3499_v57 = vld [vmem:[#allocation7 + $0x328] ss:$16 sps:$4 sm:$0xff]  }
  0xc9   :  { %1801 = vmatprep.subr.bf16.mxu0 %v3414_v56  ;;  %v3496_v56 = vld [vmem:[#allocation7 + $0x720] ss:$16 sps:$4 sm:$0xff]  }
  0xcb   :  { %1888 = vmatpush1.bf16.msra.mxu1 %v3415_v59  ;;  %v3507_v59 = vld [vmem:[#allocation7 + $0x34c] ss:$16 sps:$4 sm:$0xff]  }
  0xcc   :  { %1802 = vmatpush1.bf16.msra.mxu0 %v3412_v58  ;;  %1889 = vmatprep.subr.bf16.mxu1 %v3423_v61  ;;  %v3504_v58 = vld [vmem:[#allocation7 + $0x744] ss:$16 sps:$4 sm:$0xff]   ;;  %v3505_v61 = vld [vmem:[#allocation7 + $0x348] ss:$16 sps:$4 sm:$0xff]  }
  0xcd   :  { %1803 = vmatprep.subr.bf16.mxu0 %v3420_v60  ;;  %v3502_v60 = vld [vmem:[#allocation7 + $0x740] ss:$16 sps:$4 sm:$0xff]  }
  0xcf   :  { %1890 = vmatpush1.bf16.msra.mxu1 %v3421_v63  ;;  %v3513_v63 = vld [vmem:[#allocation7 + $0x36c] ss:$16 sps:$4 sm:$0xff]  }
  0xd0   :  { %1804 = vmatpush1.bf16.msra.mxu0 %v3418_v62  ;;  %1891 = vmatprep.subr.bf16.mxu1 %v3429_v1  ;;  %v3510_v62 = vld [vmem:[#allocation7 + $0x764] ss:$16 sps:$4 sm:$0xff]   ;;  %v3511_v1 = vld [vmem:[#allocation7 + $0x368] ss:$16 sps:$4 sm:$0xff]  }
  0xd1   :  { %1805 = vmatprep.subr.bf16.mxu0 %v3426_v0  ;;  %v3508_v0 = vld [vmem:[#allocation7 + $0x760] ss:$16 sps:$4 sm:$0xff]  }
  0xd3   :  { %1892 = vmatpush1.bf16.msra.mxu1 %v3427_v3  ;;  %v3519_v3 = vld [vmem:[#allocation7 + $0x38c] ss:$16 sps:$4 sm:$0xff]  }
  0xd4   :  { %1806 = vmatpush1.bf16.msra.mxu0 %v3424_v2  ;;  %1893 = vmatprep.subr.bf16.mxu1 %v3435_v5  ;;  %v3516_v2 = vld [vmem:[#allocation7 + $0x784] ss:$16 sps:$4 sm:$0xff]   ;;  %v3517_v5 = vld [vmem:[#allocation7 + $0x388] ss:$16 sps:$4 sm:$0xff]  }
  0xd5   :  { %1807 = vmatprep.subr.bf16.mxu0 %v3432_v4  ;;  %v3514_v4 = vld [vmem:[#allocation7 + $0x780] ss:$16 sps:$4 sm:$0xff]  }
  0xd7   :  { %1894 = vmatpush1.bf16.msra.mxu1 %v3433_v7  ;;  %v3525_v7 = vld [vmem:[#allocation7 + $0x3ac] ss:$16 sps:$4 sm:$0xff]  }
  0xd8   :  { %1808 = vmatpush1.bf16.msra.mxu0 %v3430_v6  ;;  %1895 = vmatprep.subr.bf16.mxu1 %v3441_v11  ;;  %v3522_v6 = vld [vmem:[#allocation7 + $0x7a4] ss:$16 sps:$4 sm:$0xff]   ;;  %v3523_v11 = vld [vmem:[#allocation7 + $0x3a8] ss:$16 sps:$4 sm:$0xff]  }
  0xd9   :  { %1809 = vmatprep.subr.bf16.mxu0 %v3438_v10  ;;  %v3520_v10 = vld [vmem:[#allocation7 + $0x7a0] ss:$16 sps:$4 sm:$0xff]  }
  0xdb   :  { %1896 = vmatpush1.bf16.msra.mxu1 %v3439_v13  ;;  %v3531_v13 = vld [vmem:[#allocation7 + $0x3cc] ss:$16 sps:$4 sm:$0xff]  }
  0xdc   :  { %1810 = vmatpush1.bf16.msra.mxu0 %v3436_v12  ;;  %1908 = vmatprep.subr.bf16.mxu1 %v3447_v15  ;;  %v3528_v12 = vld [vmem:[#allocation7 + $0x7c4] ss:$16 sps:$4 sm:$0xff]   ;;  %v3529_v15 = vld [vmem:[#allocation7 + $0x3c8] ss:$16 sps:$4 sm:$0xff]  }
  0xdd   :  { %1822 = vmatprep.subr.bf16.mxu0 %v3444_v14  ;;  %v3526_v14 = vld [vmem:[#allocation7 + $0x7c0] ss:$16 sps:$4 sm:$0xff]  }
  0xde   :  { %1898 = vmatmul.mubr.bf16.vlgmr.msra.gmra.mrb[4].mxu1 %v3987_v8  ;;  %v3462_v8 = vld [vmem:[#allocation7 + $0x664] ss:$16 sps:$4 sm:$0xff]  }
  0xdf   :  { %1812 = vmatmul.mubr.bf16.vlgmr.msra.gmra.mrb[0].mxu0 %v4004_v16  ;;  %1909 = vmatpush1.bf16.msra.mxu1 %v3445_v18  ;;  %v3537_v18 = vld [vmem:[#allocation7 + $0x3ec] ss:$16 sps:$4 sm:$0xff]  }
  0xe0   :  { %1823 = vmatpush1.bf16.msra.mxu0 %v3442_v17  ;;  %1910 = vmatprep.subr.bf16.mxu1 %v3453_v20  ;;  %v3534_v17 = vld [vmem:[#allocation7 + $0x7e4] ss:$16 sps:$4 sm:$0xff]   ;;  %v3535_v20 = vld [vmem:[#allocation7 + $0x3e8] ss:$16 sps:$4 sm:$0xff]  }
  0xe1   :  { %1824 = vmatprep.subr.bf16.mxu0 %v3450_v19  ;;  %1854 = vmatprep.mubr.bf16.mxu0 %v4014_v25  ;;  %v3532_v19 = vld [vmem:[#allocation7 + $0x7e0] ss:$16 sps:$4 sm:$0xff]  }
  0xe2   :  { %1940 = vmatprep.mubr.bf16.mxu1 %v3984_v55  ;;  %v3474_v55 = vld [vmem:[#allocation7 + $0x6a4] ss:$16 sps:$4 sm:$0xff]  }
  0xe3   :  { %1911 = vmatpush1.bf16.msra.mxu1 %v3451_v24  ;;  %v3538_v24 = vld [vmem:[#allocation7 + $0x408] ss:$16 sps:$4 sm:$0xff]  }
  0xe4   :  { %1825 = vmatpush1.bf16.msra.mxu0 %v3448_v23  ;;  %1912 = vmatprep.subr.bf16.mxu1 %v3459_v27  ;;  %v3540_v23 = vld [vmem:[#allocation7 + $0x40c] ss:$16 sps:$4 sm:$0xff]  }
  0xe5   :  { %1826 = vmatprep.subr.bf16.mxu0 %v3456_v26  ;;  %v4020_v26 = vcombine.low %v4006_v21, %v4008_v22  ;;  %v3543_v27 = vld [vmem:[#allocation7 + $0x42c] ss:$16 sps:$4 sm:$0xff]   ;;  %v3639_v21 = vld [vmem:[#allocation8 + $0x10] ss:$8 sps:$4 sm:$0xff]  }
  0xe6   :  { %v3640_v22 = vld [vmem:[#allocation8 + $0x24] ss:$8 sps:$4 sm:$0xff]  }
  0xe7   :  { %1913 = vmatpush1.bf16.msra.mxu1 %v3457_v29  ;;  %v3636_v29 = vld [vmem:[#allocation8] ss:$8 sps:$4 sm:$0xff]  }
  0xe8   :  { %1827 = vmatpush1.bf16.msra.mxu0 %v3454_v28  ;;  %1914 = vmatprep.subr.bf16.mxu1 %v3465_v30  ;;  %v3634_v28 = vld [vmem:[#allocation8 + $0x4] ss:$8 sps:$4 sm:$0xff]   ;;  %v3541_v30 = vld [vmem:[#allocation7 + $0x428] ss:$16 sps:$4 sm:$0xff]  }
  0xe9   :  { %1828 = vmatprep.subr.bf16.mxu0 %v3462_v8  ;;  %v3637_v8 = vld [vmem:[#allocation8 + $0x14] ss:$8 sps:$4 sm:$0xff]  }
  0xeb   :  { %1915 = vmatpush1.bf16.msra.mxu1 %v3463_v32  ;;  %v3544_v32 = vld [vmem:[#allocation7 + $0x448] ss:$16 sps:$4 sm:$0xff]  }
  0xec   :  { %1829 = vmatpush1.bf16.msra.mxu0 %v3460_v31  ;;  %1916 = vmatprep.subr.bf16.mxu1 %v3471_v34  ;;  %v3546_v31 = vld [vmem:[#allocation7 + $0x44c] ss:$16 sps:$4 sm:$0xff]  }
  0xed   :  { %1830 = vmatprep.subr.bf16.mxu0 %v3468_v33  ;;  %v3549_v33 = vld [vmem:[#allocation7 + $0x46c] ss:$16 sps:$4 sm:$0xff]  }
  0xee   :  { %v3643_v34 = vld [vmem:[#allocation8 + $0x34] ss:$8 sps:$4 sm:$0xff]  }
  0xef   :  { %1917 = vmatpush1.bf16.msra.mxu1 %v3469_v36  ;;  %v3552_v36 = vld [vmem:[#allocation7 + $0x48c] ss:$16 sps:$4 sm:$0xff]  }
  0xf0   :  { %1831 = vmatpush1.bf16.msra.mxu0 %v3466_v35  ;;  %1918 = vmatprep.subr.bf16.mxu1 %v3477_v37  ;;  %v3547_v35 = vld [vmem:[#allocation7 + $0x468] ss:$16 sps:$4 sm:$0xff]  }
  0xf1   :  { %1832 = vmatprep.subr.bf16.mxu0 %v3474_v55  ;;  %v3646_v55 = vld [vmem:[#allocation8 + $0x44] ss:$8 sps:$4 sm:$0xff]   ;;  %v3550_v37 = vld [vmem:[#allocation7 + $0x488] ss:$16 sps:$4 sm:$0xff]  }
  0xf3   :  { %1919 = vmatpush1.bf16.msra.mxu1 %v3475_v40  ;;  %v3648_v40 = vld [vmem:[#allocation8 + $0x40] ss:$8 sps:$4 sm:$0xff]  }
  0xf4   :  { %1833 = vmatpush1.bf16.msra.mxu0 %v3472_v39  ;;  %1920 = vmatprep.subr.bf16.mxu1 %v3483_v42  ;;  %v3555_v39 = vld [vmem:[#allocation7 + $0x4ac] ss:$16 sps:$4 sm:$0xff]   ;;  %v3553_v42 = vld [vmem:[#allocation7 + $0x4a8] ss:$16 sps:$4 sm:$0xff]  }
  0xf5   :  { %1834 = vmatprep.subr.bf16.mxu0 %v3480_v41  ;;  %v3649_v41 = vld [vmem:[#allocation8 + $0x54] ss:$8 sps:$4 sm:$0xff]  }
  0xf7   :  { %1921 = vmatpush1.bf16.msra.mxu1 %v3481_v44  ;;  %v3651_v44 = vld [vmem:[#allocation8 + $0x50] ss:$8 sps:$4 sm:$0xff]  }
  0xf8   :  { %1835 = vmatpush1.bf16.msra.mxu0 %v3478_v43  ;;  %1922 = vmatprep.subr.bf16.mxu1 %v3489_v46  ;;  %v3558_v43 = vld [vmem:[#allocation7 + $0x4cc] ss:$16 sps:$4 sm:$0xff]   ;;  %v3556_v46 = vld [vmem:[#allocation7 + $0x4c8] ss:$16 sps:$4 sm:$0xff]  }
  0xf9   :  { %1836 = vmatprep.subr.bf16.mxu0 %v3486_v45  ;;  %v3652_v45 = vld [vmem:[#allocation8 + $0x64] ss:$8 sps:$4 sm:$0xff]  }
  0xfb   :  { %1923 = vmatpush1.bf16.msra.mxu1 %v3487_v48  ;;  %v3654_v48 = vld [vmem:[#allocation8 + $0x60] ss:$8 sps:$4 sm:$0xff]  }
  0xfc   :  { %1837 = vmatpush1.bf16.msra.mxu0 %v3484_v47  ;;  %1924 = vmatprep.subr.bf16.mxu1 %v3495_v50  ;;  %v3561_v47 = vld [vmem:[#allocation7 + $0x4ec] ss:$16 sps:$4 sm:$0xff]   ;;  %v3559_v50 = vld [vmem:[#allocation7 + $0x4e8] ss:$16 sps:$4 sm:$0xff]  }
  0xfd   :  { %1838 = vmatprep.subr.bf16.mxu0 %v3492_v49  ;;  %v3655_v49 = vld [vmem:[#allocation8 + $0x74] ss:$8 sps:$4 sm:$0xff]  }
  0xff   :  { %1925 = vmatpush1.bf16.msra.mxu1 %v3493_v52  ;;  %v3657_v52 = vld [vmem:[#allocation8 + $0x70] ss:$8 sps:$4 sm:$0xff]  }
 0x100   :  { %1839 = vmatpush1.bf16.msra.mxu0 %v3490_v51  ;;  %1926 = vmatprep.subr.bf16.mxu1 %v3501_v54  ;;  %v3564_v51 = vld [vmem:[#allocation7 + $0x50c] ss:$16 sps:$4 sm:$0xff]   ;;  %v3562_v54 = vld [vmem:[#allocation7 + $0x508] ss:$16 sps:$4 sm:$0xff]  }
 0x101   :  { %1840 = vmatprep.subr.bf16.mxu0 %v3498_v53  ;;  %v3658_v53 = vld [vmem:[#allocation8 + $0x84] ss:$8 sps:$4 sm:$0xff]  }
 0x103   :  { %1927 = vmatpush1.bf16.msra.mxu1 %v3499_v57  ;;  %v3660_v57 = vld [vmem:[#allocation8 + $0x80] ss:$8 sps:$4 sm:$0xff]  }
 0x104   :  { %1841 = vmatpush1.bf16.msra.mxu0 %v3496_v56  ;;  %1928 = vmatprep.subr.bf16.mxu1 %v3507_v59  ;;  %v3567_v56 = vld [vmem:[#allocation7 + $0x52c] ss:$16 sps:$4 sm:$0xff]   ;;  %v3565_v59 = vld [vmem:[#allocation7 + $0x528] ss:$16 sps:$4 sm:$0xff]  }
 0x105   :  { %1842 = vmatprep.subr.bf16.mxu0 %v3504_v58  ;;  %v3661_v58 = vld [vmem:[#allocation8 + $0x94] ss:$8 sps:$4 sm:$0xff]  }
 0x107   :  { %1929 = vmatpush1.bf16.msra.mxu1 %v3505_v61  ;;  %v3663_v61 = vld [vmem:[#allocation8 + $0x90] ss:$8 sps:$4 sm:$0xff]  }
 0x108   :  { %1843 = vmatpush1.bf16.msra.mxu0 %v3502_v60  ;;  %1930 = vmatprep.subr.bf16.mxu1 %v3513_v63  ;;  %v3570_v60 = vld [vmem:[#allocation7 + $0x54c] ss:$16 sps:$4 sm:$0xff]   ;;  %v3568_v63 = vld [vmem:[#allocation7 + $0x548] ss:$16 sps:$4 sm:$0xff]  }
 0x109   :  { %1844 = vmatprep.subr.bf16.mxu0 %v3510_v62  ;;  %v3664_v62 = vld [vmem:[#allocation8 + $0xa4] ss:$8 sps:$4 sm:$0xff]  }
 0x10b   :  { %1931 = vmatpush1.bf16.msra.mxu1 %v3511_v1  ;;  %v3666_v1 = vld [vmem:[#allocation8 + $0xa0] ss:$8 sps:$4 sm:$0xff]  }
 0x10c   :  { %1845 = vmatpush1.bf16.msra.mxu0 %v3508_v0  ;;  %1932 = vmatprep.subr.bf16.mxu1 %v3519_v3  ;;  %v3573_v0 = vld [vmem:[#allocation7 + $0x56c] ss:$16 sps:$4 sm:$0xff]   ;;  %v3571_v3 = vld [vmem:[#allocation7 + $0x568] ss:$16 sps:$4 sm:$0xff]  }
 0x10d   :  { %1846 = vmatprep.subr.bf16.mxu0 %v3516_v2  ;;  %v3667_v2 = vld [vmem:[#allocation8 + $0xb4] ss:$8 sps:$4 sm:$0xff]  }
 0x10f   :  { %1933 = vmatpush1.bf16.msra.mxu1 %v3517_v5  ;;  %v3669_v5 = vld [vmem:[#allocation8 + $0xb0] ss:$8 sps:$4 sm:$0xff]  }
 0x110   :  { %1847 = vmatpush1.bf16.msra.mxu0 %v3514_v4  ;;  %1934 = vmatprep.subr.bf16.mxu1 %v3525_v7  ;;  %v3576_v4 = vld [vmem:[#allocation7 + $0x58c] ss:$16 sps:$4 sm:$0xff]   ;;  %v3574_v7 = vld [vmem:[#allocation7 + $0x588] ss:$16 sps:$4 sm:$0xff]  }
 0x111   :  { %1848 = vmatprep.subr.bf16.mxu0 %v3522_v6  ;;  %v3670_v6 = vld [vmem:[#allocation8 + $0xc4] ss:$8 sps:$4 sm:$0xff]  }
 0x113   :  { %1935 = vmatpush1.bf16.msra.mxu1 %v3523_v11  ;;  %v3672_v11 = vld [vmem:[#allocation8 + $0xc0] ss:$8 sps:$4 sm:$0xff]  }
 0x114   :  { %1849 = vmatpush1.bf16.msra.mxu0 %v3520_v10  ;;  %1936 = vmatprep.subr.bf16.mxu1 %v3531_v13  ;;  %v3579_v10 = vld [vmem:[#allocation7 + $0x5ac] ss:$16 sps:$4 sm:$0xff]   ;;  %v3577_v13 = vld [vmem:[#allocation7 + $0x5a8] ss:$16 sps:$4 sm:$0xff]  }
 0x115   :  { %1850 = vmatprep.subr.bf16.mxu0 %v3528_v12  ;;  %v3673_v12 = vld [vmem:[#allocation8 + $0xd4] ss:$8 sps:$4 sm:$0xff]  }
 0x117   :  { %1937 = vmatpush1.bf16.msra.mxu1 %v3529_v15  ;;  %v3675_v15 = vld [vmem:[#allocation8 + $0xd0] ss:$8 sps:$4 sm:$0xff]  }
 0x118   :  { %1851 = vmatpush1.bf16.msra.mxu0 %v3526_v14  ;;  %1938 = vmatprep.subr.bf16.mxu1 %v3537_v18  ;;  %v3582_v14 = vld [vmem:[#allocation7 + $0x5cc] ss:$16 sps:$4 sm:$0xff]   ;;  %v3580_v18 = vld [vmem:[#allocation7 + $0x5c8] ss:$16 sps:$4 sm:$0xff]  }
 0x119   :  { %1852 = vmatprep.subr.bf16.mxu0 %v3534_v17  ;;  %v3676_v17 = vld [vmem:[#allocation8 + $0xe4] ss:$8 sps:$4 sm:$0xff]  }
 0x11b   :  { %1939 = vmatpush1.bf16.msra.mxu1 %v3535_v20  ;;  %v3678_v20 = vld [vmem:[#allocation8 + $0xe0] ss:$8 sps:$4 sm:$0xff]  }
 0x11c   :  { %1853 = vmatpush1.bf16.msra.mxu0 %v3532_v19  ;;  %1951 = vmatprep.subr.bf16.mxu1 %v3540_v23  ;;  %v3585_v19 = vld [vmem:[#allocation7 + $0x5ec] ss:$16 sps:$4 sm:$0xff]   ;;  %v3583_v23 = vld [vmem:[#allocation7 + $0x5e8] ss:$16 sps:$4 sm:$0xff]  }
 0x11d   :  { %2957 = vmatprep.subr.bf16.mxu0 %v3634_v28  ;;  %v3591_v28 = vld [vmem:[#allocation7 + $0x62c] ss:$16 sps:$4 sm:$0xff]  }
 0x11e   :  { %1941 = vmatmul.mubr.bf16.vlgmr.msra.gmra.mrb[4].mxu1 %v3989_v9  ;;  %v3642_v9 = vld [vmem:[#allocation8 + $0x20] ss:$8 sps:$4 sm:$0xff]  }
 0x11f   :  { %1855 = vmatmul.mubr.bf16.vlgmr.msra.gmra.mrb[0].mxu0 %v4020_v26  ;;  %1952 = vmatpush1.bf16.msra.mxu1 %v3538_v24  ;;  %v3588_v24 = vld [vmem:[#allocation7 + $0x60c] ss:$16 sps:$4 sm:$0xff]  }
 0x120   :  { %1983 = vmatprep.mubr.bf16.mxu1 %v3999_v38  ;;  %1953 = vmatprep.subr.bf16.mxu1 %v3543_v27  ;;  %v3645_v38 = vld [vmem:[#allocation8 + $0x30] ss:$8 sps:$4 sm:$0xff]  }
 0x121   :  { %2959 = vmatpush1.bf16.msra.mxu0 %v3636_v29  ;;  %v3586_v27 = vld [vmem:[#allocation7 + $0x608] ss:$16 sps:$4 sm:$0xff]  }
 0x122   :  { %2961 = vmatprep.subr.bf16.mxu0 %v3637_v8  ;;  %v3589_v29 = vld [vmem:[#allocation7 + $0x628] ss:$16 sps:$4 sm:$0xff]   ;;  %v3594_v8 = vld [vmem:[#allocation7 + $0x64c] ss:$16 sps:$4 sm:$0xff]  }
 0x123   :  { %1954 = vmatpush1.bf16.msra.mxu1 %v3541_v30  ;;  %v3592_v30 = vld [vmem:[#allocation7 + $0x648] ss:$16 sps:$4 sm:$0xff]  }
 0x124   :  { %1955 = vmatprep.subr.bf16.mxu1 %v3546_v31  ;;  %v3597_v31 = vld [vmem:[#allocation7 + $0x66c] ss:$16 sps:$4 sm:$0xff]  }
 0x125   :  { %2963 = vmatpush1.bf16.msra.mxu0 %v3639_v21  ;;  %v3595_v21 = vld [vmem:[#allocation7 + $0x668] ss:$16 sps:$4 sm:$0xff]  }
 0x126   :  { %2965 = vmatprep.subr.bf16.mxu0 %v3640_v22  ;;  %v3600_v22 = vld [vmem:[#allocation7 + $0x68c] ss:$16 sps:$4 sm:$0xff]  }
 0x127   :  { %1956 = vmatpush1.bf16.msra.mxu1 %v3544_v32  ;;  %v3598_v32 = vld [vmem:[#allocation7 + $0x688] ss:$16 sps:$4 sm:$0xff]  }
 0x128   :  { %1957 = vmatprep.subr.bf16.mxu1 %v3549_v33  ;;  %v3603_v33 = vld [vmem:[#allocation7 + $0x6ac] ss:$16 sps:$4 sm:$0xff]  }
 0x129   :  { %2967 = vmatpush1.bf16.msra.mxu0 %v3642_v9  ;;  %v3606_v9 = vld [vmem:[#allocation7 + $0x6cc] ss:$16 sps:$4 sm:$0xff]  }
 0x12a   :  { %2969 = vmatprep.subr.bf16.mxu0 %v3643_v34 }
 0x12b   :  { %1958 = vmatpush1.bf16.msra.mxu1 %v3547_v35  ;;  %v3679_v35 = vld [vmem:[#allocation8 + $0xf4] ss:$8 sps:$4 sm:$0xff]  }
 0x12c   :  { %1959 = vmatprep.subr.bf16.mxu1 %v3552_v36 }
 0x12d   :  { %2971 = vmatpush1.bf16.msra.mxu0 %v3645_v38  ;;  %v3604_v38 = vld [vmem:[#allocation7 + $0x6c8] ss:$16 sps:$4 sm:$0xff]  }
 0x12e   :  { %2973 = vmatprep.subr.bf16.mxu0 %v3646_v55  ;;  %v3681_v55 = vld [vmem:[#allocation8 + $0xf0] ss:$8 sps:$4 sm:$0xff]  }
 0x12f   :  { %1960 = vmatpush1.bf16.msra.mxu1 %v3550_v37 }
 0x130   :  { %1961 = vmatprep.subr.bf16.mxu1 %v3555_v39  ;;  %v3609_v39 = vld [vmem:[#allocation7 + $0x6ec] ss:$16 sps:$4 sm:$0xff]  }
 0x131   :  { %2975 = vmatpush1.bf16.msra.mxu0 %v3648_v40  ;;  %v3607_v40 = vld [vmem:[#allocation7 + $0x6e8] ss:$16 sps:$4 sm:$0xff]  }
 0x132   :  { %2977 = vmatprep.subr.bf16.mxu0 %v3649_v41  ;;  %v3612_v41 = vld [vmem:[#allocation7 + $0x70c] ss:$16 sps:$4 sm:$0xff]  }
 0x133   :  { %1962 = vmatpush1.bf16.msra.mxu1 %v3553_v42  ;;  %v3610_v42 = vld [vmem:[#allocation7 + $0x708] ss:$16 sps:$4 sm:$0xff]  }
 0x134   :  { %1963 = vmatprep.subr.bf16.mxu1 %v3558_v43  ;;  %v3615_v43 = vld [vmem:[#allocation7 + $0x72c] ss:$16 sps:$4 sm:$0xff]  }
 0x135   :  { %2979 = vmatpush1.bf16.msra.mxu0 %v3651_v44  ;;  %v3682_v44 = vld [vmem:[#allocation8 + $0x104] ss:$8 sps:$4 sm:$0xff]  }
 0x136   :  { %2981 = vmatprep.subr.bf16.mxu0 %v3652_v45  ;;  %v3613_v45 = vld [vmem:[#allocation7 + $0x728] ss:$16 sps:$4 sm:$0xff]  }
 0x137   :  { %1964 = vmatpush1.bf16.msra.mxu1 %v3556_v46  ;;  %v3618_v46 = vld [vmem:[#allocation7 + $0x74c] ss:$16 sps:$4 sm:$0xff]  }
 0x138   :  { %1965 = vmatprep.subr.bf16.mxu1 %v3561_v47  ;;  %v3616_v47 = vld [vmem:[#allocation7 + $0x748] ss:$16 sps:$4 sm:$0xff]  }
 0x139   :  { %2983 = vmatpush1.bf16.msra.mxu0 %v3654_v48  ;;  %v3621_v48 = vld [vmem:[#allocation7 + $0x76c] ss:$16 sps:$4 sm:$0xff]  }
 0x13a   :  { %2985 = vmatprep.subr.bf16.mxu0 %v3655_v49  ;;  %v3619_v49 = vld [vmem:[#allocation7 + $0x768] ss:$16 sps:$4 sm:$0xff]  }
 0x13b   :  { %1966 = vmatpush1.bf16.msra.mxu1 %v3559_v50  ;;  %v3624_v50 = vld [vmem:[#allocation7 + $0x78c] ss:$16 sps:$4 sm:$0xff]  }
 0x13c   :  { %1967 = vmatprep.subr.bf16.mxu1 %v3564_v51  ;;  %v3622_v51 = vld [vmem:[#allocation7 + $0x788] ss:$16 sps:$4 sm:$0xff]  }
 0x13d   :  { %2987 = vmatpush1.bf16.msra.mxu0 %v3657_v52  ;;  %v3627_v52 = vld [vmem:[#allocation7 + $0x7ac] ss:$16 sps:$4 sm:$0xff]  }
 0x13e   :  { %2989 = vmatprep.subr.bf16.mxu0 %v3658_v53  ;;  %v3625_v53 = vld [vmem:[#allocation7 + $0x7a8] ss:$16 sps:$4 sm:$0xff]  }
 0x13f   :  { %1968 = vmatpush1.bf16.msra.mxu1 %v3562_v54  ;;  %v3630_v54 = vld [vmem:[#allocation7 + $0x7cc] ss:$16 sps:$4 sm:$0xff]  }
 0x140   :  { %1969 = vmatprep.subr.bf16.mxu1 %v3567_v56  ;;  %v3628_v56 = vld [vmem:[#allocation7 + $0x7c8] ss:$16 sps:$4 sm:$0xff]  }
 0x141   :  { %2991 = vmatpush1.bf16.msra.mxu0 %v3660_v57  ;;  %v3633_v57 = vld [vmem:[#allocation7 + $0x7ec] ss:$16 sps:$4 sm:$0xff]  }
 0x142   :  { %2993 = vmatprep.subr.bf16.mxu0 %v3661_v58  ;;  %v3631_v58 = vld [vmem:[#allocation7 + $0x7e8] ss:$16 sps:$4 sm:$0xff]  }
 0x143   :  { %1970 = vmatpush1.bf16.msra.mxu1 %v3565_v59  ;;  %v353_v59 = vlaneseq }
 0x144   :  { %1971 = vmatprep.subr.bf16.mxu1 %v3570_v60 }
 0x145   :  { %2995 = vmatpush1.bf16.msra.mxu0 %v3663_v61  ;;  %v4028_v60 = vshrl.u32 %v353_v59, 7  ;;  %v3726_v59 = vld [vmem:[#allocation8 + $0x1e0] ss:$8 sps:$4 sm:$0xff]  }
 0x146   :  { %2997 = vmatprep.subr.bf16.mxu0 %v3664_v62  ;;  %v4031_v62 = vld [vmem:[#allocation5] sm:$0xf] }
 0x147   :  { %1972 = vmatpush1.bf16.msra.mxu1 %v3568_v63  ;;  %v355_v61 = vsub.s32 0, %v4028_v60  ;;  %v359_v63 = vsub.s32 1, %v4028_v60 }
 0x148   :  { %1973 = vmatprep.subr.bf16.mxu1 %v3573_v0 }
 0x149   :  { %2999 = vmatpush1.bf16.msra.mxu0 %v3666_v1  ;;  %v356_v0 = vrot.slane %v4031_v62, %v355_v61  ;;  %v360_v1 = vrot.slane %v4031_v62, %v359_v63 }
 0x14a   :  { %3001 = vmatprep.subr.bf16.mxu0 %v3667_v2 }
 0x14b   :  { %1974 = vmatpush1.bf16.msra.mxu1 %v3571_v3 }
 0x14c   :  { %1975 = vmatprep.subr.bf16.mxu1 %v3576_v4 }
 0x14d   :  { %3003 = vmatpush1.bf16.msra.mxu0 %v3669_v5 }
 0x14e   :  { %3005 = vmatprep.subr.bf16.mxu0 %v3670_v6 }
 0x14f   :  { %1976 = vmatpush1.bf16.msra.mxu1 %v3574_v7 }
 0x150   :  { %1977 = vmatprep.subr.bf16.mxu1 %v3579_v10 }
 0x151   :  { %3007 = vmatpush1.bf16.msra.mxu0 %v3672_v11 }
 0x152   :  { %3009 = vmatprep.subr.bf16.mxu0 %v3673_v12 }
 0x153   :  { %1978 = vmatpush1.bf16.msra.mxu1 %v3577_v13 }
 0x154   :  { %1979 = vmatprep.subr.bf16.mxu1 %v3582_v14 }
 0x155   :  { %3011 = vmatpush1.bf16.msra.mxu0 %v3675_v15 }
 0x156   :  { %3013 = vmatprep.subr.bf16.mxu0 %v3676_v17  ;;  %v3684_v17 = vld [vmem:[#allocation8 + $0x100] ss:$8 sps:$4 sm:$0xff]  }
 0x157   :  { %1980 = vmatpush1.bf16.msra.mxu1 %v3580_v18 }
 0x158   :  { %1981 = vmatprep.subr.bf16.mxu1 %v3585_v19  ;;  %v3685_v19 = vld [vmem:[#allocation8 + $0x114] ss:$8 sps:$4 sm:$0xff]  }
 0x159   :  { %3015 = vmatpush1.bf16.msra.mxu0 %v3678_v20 }
 0x15a   :  { %3017 = vmatprep.subr.bf16.mxu0 %v3679_v35  ;;  %v3699_v35 = vld [vmem:[#allocation8 + $0x150] ss:$8 sps:$4 sm:$0xff]  }
 0x15b   :  { %1982 = vmatpush1.bf16.msra.mxu1 %v3583_v23  ;;  %v3687_v23 = vld [vmem:[#allocation8 + $0x110] ss:$8 sps:$4 sm:$0xff]  }
 0x15c   :  { %1994 = vmatprep.subr.bf16.mxu1 %v3588_v24 }
 0x15d   :  { %3019 = vmatpush1.bf16.msra.mxu0 %v3681_v55  ;;  %v4063_v55 = vld [vmem:[#allocation10 + $0x60] sm:$0xff]  }
 0x15e   :  { %1984 = vmatmul.mubr.bf16.vlgmr.msra.gmra.mrb[4].mxu1 %v4004_v16  ;;  %v3601_v16 = vld [vmem:[#allocation7 + $0x6a8] ss:$16 sps:$4 sm:$0xff]   ;;  %3021 = vmatprep.subr.bf16.mxu0 %v3682_v44  ;;  %v3706_v44 = vld [vmem:[#allocation8 + $0x184] ss:$8 sps:$4 sm:$0xff]  }
 0x15f   :  { %1995 = vmatpush1.bf16.msra.mxu1 %v3586_v27  ;;  %2026 = vmatprep.mubr.bf16.mxu1 %v4014_v25  ;;  %v3688_v27 = vld [vmem:[#allocation8 + $0x124] ss:$8 sps:$4 sm:$0xff]  }
 0x160   :  { %1996 = vmatprep.subr.bf16.mxu1 %v3591_v28  ;;  %v4040_v28 = vld [vmem:[#allocation10 + $0x40] sm:$0xff]  }
 0x163   :  { %1997 = vmatpush1.bf16.msra.mxu1 %v3589_v29  ;;  %v3690_v29 = vld [vmem:[#allocation8 + $0x120] ss:$8 sps:$4 sm:$0xff]  }
 0x164   :  { %1998 = vmatprep.subr.bf16.mxu1 %v3594_v8  ;;  %v4042_v8 = vld [vmem:[#allocation10] sm:$0xff]  }
 0x167   :  { %1999 = vmatpush1.bf16.msra.mxu1 %v3592_v30  ;;  %v3691_v30 = vld [vmem:[#allocation8 + $0x134] ss:$8 sps:$4 sm:$0xff]  }
 0x168   :  { %2000 = vmatprep.subr.bf16.mxu1 %v3597_v31  ;;  %v4045_v31 = vld [vmem:[#allocation10 + $0x48] sm:$0xff]  }
 0x16b   :  { %2001 = vmatpush1.bf16.msra.mxu1 %v3595_v21  ;;  %v3693_v21 = vld [vmem:[#allocation8 + $0x130] ss:$8 sps:$4 sm:$0xff]  }
 0x16c   :  { %2002 = vmatprep.subr.bf16.mxu1 %v3600_v22  ;;  %v4049_v22 = vld [vmem:[#allocation10 + $0x8] sm:$0xff]  }
 0x16f   :  { %2003 = vmatpush1.bf16.msra.mxu1 %v3598_v32  ;;  %v3694_v32 = vld [vmem:[#allocation8 + $0x144] ss:$8 sps:$4 sm:$0xff]  }
 0x170   :  { %2004 = vmatprep.subr.bf16.mxu1 %v3603_v33  ;;  %v4051_v33 = vld [vmem:[#allocation10 + $0x50] sm:$0xff]  }
 0x171   :  { %v1727_v34 = vpop.f32.mrb[0].mxu1 }
 0x172   :  { %v1729_v25 = vpop.f32.mrb[1].mxu1  ;;  %v1728_v2 = vadd.f32 %v1727_v34, %v356_v0  ;;  %v3697_v34 = vld [vmem:[#allocation8 + $0x154] ss:$8 sps:$4 sm:$0xff]  }
 0x173   :  { %v1731_v36 = vpop.f32.mrb[2].mxu1  ;;  %2005 = vmatpush1.bf16.msra.mxu1 %v3601_v16  ;;  %v1730_v3 = vadd.f32 %v1729_v25, %v360_v1  ;;  %v3696_v16 = vld [vmem:[#allocation8 + $0x140] ss:$8 sps:$4 sm:$0xff]   ;;  %v4057_v25 = vld [vmem:[#allocation10 + $0x58] sm:$0xff]  }
 0x174   :  { %v1733_v37 = vpop.f32.mrb[3].mxu1  ;;  %2006 = vmatprep.subr.bf16.mxu1 %v3606_v9  ;;  %v1732_v4 = vadd.f32 %v1731_v36, %v356_v0  ;;  %v4055_v9 = vld [vmem:[#allocation10 + $0x10] sm:$0xff]   ;;  %v4061_v36 = vld [vmem:[#allocation10 + $0x18] sm:$0xff]  }
 0x175   :  { %v1734_v7 = vadd.f32 %v1733_v37, %v360_v1  ;;  %v3702_v37 = vld [vmem:[#allocation8 + $0x160] ss:$8 sps:$4 sm:$0xff]   ;;  %v3727_v0 = vld [vmem:[#allocation8 + $0x1f4] ss:$8 sps:$4 sm:$0xff]   ;;  %v3729_v1 = vld [vmem:[#allocation8 + $0x1f0] ss:$8 sps:$4 sm:$0xff]  }
 0x177   :  { %2007 = vmatpush1.bf16.msra.mxu1 %v3604_v38  ;;  %v3700_v38 = vld [vmem:[#allocation8 + $0x164] ss:$8 sps:$4 sm:$0xff]  }
 0x178   :  { %2008 = vmatprep.subr.bf16.mxu1 %v3609_v39  ;;  %v4067_v39 = vld [vmem:[#allocation10 + $0x20] sm:$0xff]  }
 0x17b   :  { %2009 = vmatpush1.bf16.msra.mxu1 %v3607_v40  ;;  %v3703_v40 = vld [vmem:[#allocation8 + $0x174] ss:$8 sps:$4 sm:$0xff]  }
 0x17c   :  { %2010 = vmatprep.subr.bf16.mxu1 %v3612_v41  ;;  %v4069_v41 = vld [vmem:[#allocation10 + $0x68] sm:$0xff]  }
 0x17f   :  { %2011 = vmatpush1.bf16.msra.mxu1 %v3610_v42  ;;  %v3705_v42 = vld [vmem:[#allocation8 + $0x170] ss:$8 sps:$4 sm:$0xff]  }
 0x180   :  { %2012 = vmatprep.subr.bf16.mxu1 %v3615_v43  ;;  %v4073_v43 = vld [vmem:[#allocation10 + $0x28] sm:$0xff]  }
 0x183   :  { %2013 = vmatpush1.bf16.msra.mxu1 %v3613_v45  ;;  %v4075_v45 = vld [vmem:[#allocation10 + $0x70] sm:$0xff]  }
 0x184   :  { %2014 = vmatprep.subr.bf16.mxu1 %v3618_v46  ;;  %v3708_v46 = vld [vmem:[#allocation8 + $0x180] ss:$8 sps:$4 sm:$0xff]  }
 0x187   :  { %2015 = vmatpush1.bf16.msra.mxu1 %v3616_v47  ;;  %v3709_v47 = vld [vmem:[#allocation8 + $0x194] ss:$8 sps:$4 sm:$0xff]  }
 0x188   :  { %2016 = vmatprep.subr.bf16.mxu1 %v3621_v48  ;;  %v3711_v48 = vld [vmem:[#allocation8 + $0x190] ss:$8 sps:$4 sm:$0xff]  }
 0x18b   :  { %2017 = vmatpush1.bf16.msra.mxu1 %v3619_v49  ;;  %v3712_v49 = vld [vmem:[#allocation8 + $0x1a4] ss:$8 sps:$4 sm:$0xff]  }
 0x18c   :  { %2018 = vmatprep.subr.bf16.mxu1 %v3624_v50  ;;  %v3714_v50 = vld [vmem:[#allocation8 + $0x1a0] ss:$8 sps:$4 sm:$0xff]  }
 0x18f   :  { %2019 = vmatpush1.bf16.msra.mxu1 %v3622_v51  ;;  %v3715_v51 = vld [vmem:[#allocation8 + $0x1b4] ss:$8 sps:$4 sm:$0xff]  }
 0x190   :  { %2020 = vmatprep.subr.bf16.mxu1 %v3627_v52  ;;  %v3717_v52 = vld [vmem:[#allocation8 + $0x1b0] ss:$8 sps:$4 sm:$0xff]  }
 0x193   :  { %2021 = vmatpush1.bf16.msra.mxu1 %v3625_v53  ;;  %v3718_v53 = vld [vmem:[#allocation8 + $0x1c4] ss:$8 sps:$4 sm:$0xff]  }
 0x194   :  { %2022 = vmatprep.subr.bf16.mxu1 %v3630_v54  ;;  %v3720_v54 = vld [vmem:[#allocation8 + $0x1c0] ss:$8 sps:$4 sm:$0xff]  }
 0x197   :  { %2023 = vmatpush1.bf16.msra.mxu1 %v3628_v56  ;;  %v3721_v56 = vld [vmem:[#allocation8 + $0x1d4] ss:$8 sps:$4 sm:$0xff]  }
 0x198   :  { %2024 = vmatprep.subr.bf16.mxu1 %v3633_v57  ;;  %v3723_v57 = vld [vmem:[#allocation8 + $0x1d0] ss:$8 sps:$4 sm:$0xff]  }
 0x19b   :  { %2025 = vmatpush1.bf16.msra.mxu1 %v3631_v58  ;;  %v3724_v58 = vld [vmem:[#allocation8 + $0x1e4] ss:$8 sps:$4 sm:$0xff]  }
 0x19c   :  { %3116 = vmatprep.subr.bf16.mxu1 %v4040_v28 }
 0x19e   :  { %2027 = vmatmul.mubr.bf16.vlgmr.msra.gmra.mrb[4].mxu1 %v4020_v26 }
 0x19f   :  { %3124 = vmatpush3.bf16.msra.mxu1 %v4042_v8 }
 0x1a0   :  { %3117 = vmatprep.subr.bf16.mxu1 %v4045_v31 }
 0x1a3   :  { %3125 = vmatpush3.bf16.msra.mxu1 %v4049_v22 }
 0x1a4   :  { %3118 = vmatprep.subr.bf16.mxu1 %v4051_v33 }
 0x1a7   :  { %3126 = vmatpush3.bf16.msra.mxu1 %v4055_v9 }
 0x1a8   :  { %3119 = vmatprep.subr.bf16.mxu1 %v4057_v25 }
 0x1ab   :  { %3127 = vmatpush3.bf16.msra.mxu1 %v4061_v36 }
 0x1ac   :  { %3120 = vmatprep.subr.bf16.mxu1 %v4063_v55 }
 0x1af   :  { %3128 = vmatpush3.bf16.msra.mxu1 %v4067_v39 }
 0x1b0   :  { %3121 = vmatprep.subr.bf16.mxu1 %v4069_v41 }
 0x1b3   :  { %3129 = vmatpush3.bf16.msra.mxu1 %v4073_v43 }
 0x1b4   :  { %3122 = vmatprep.subr.bf16.mxu1 %v4075_v45 }
 0x1f2   :  { %v1856_v26 = vpop.f32.mrb[0].mxu0 }
 0x1f3   :  { %v3133_v5 = vadd.f32 %v1856_v26, %v1728_v2  ;;  %v1858_v6 = vpop.f32.mrb[1].mxu0  ;;  %v363_v2 = vsub.s32 2, %v4028_v60 }
 0x1f4   :  { %v3135_v10 = vadd.f32 %v1858_v6, %v1730_v3  ;;  %v1860_v11 = vpop.f32.mrb[2].mxu0  ;;  %v367_v3 = vsub.s32 3, %v4028_v60 }
 0x1f5   :  { %v3137_v12 = vadd.f32 %v1860_v11, %v1732_v4  ;;  %v1862_v13 = vpop.f32.mrb[3].mxu0  ;;  %v2037_v18 = vmax.f32 %v3133_v5, 0.0  ;;  %v364_v26 = vrot.slane %v4031_v62, %v363_v2 }
 0x1f6   :  { %v2038_v14 = vmax.f32 %v3135_v10, 0.0  ;;  %v3139_v15 = vadd.f32 %v1862_v13, %v1734_v7  ;;  %v368_v4 = vrot.slane %v4031_v62, %v367_v3  ;;  %v2908_v62 = vld [vmem:[#allocation10 + $0x30] sm:$0xff]  }
 0x1f7   :  { %v2041_v24 = vmax.f32 %v3137_v12, 0.0  ;;  %3130 = vmatpush3.bf16.msra.mxu1 %v2908_v62 }
 0x1f8   :  { %v2042_v20 = vmax.f32 %v3139_v15, 0.0  ;;  %2313 = vmatprep.mubr.f32.mxu0 %v2038_v14 }
 0x1f9   :  { %2314 = vmatmul.mubr.f32.vlgmr.msra.gmra.mrb[4].mxu0 %v2037_v18 }
 0x1fa   :  { %2319 = vmatprep.mubr.f32.mxu0 %v2042_v20  ;;  %3023 = vmatpush1.bf16.msra.mxu0 %v3684_v17  ;;  %v2917_v20 = vld [vmem:[#allocation10 + $0x78] sm:$0xff]  }
 0x1fb   :  { %3025 = vmatprep.subr.bf16.mxu0 %v3685_v19  ;;  %3123 = vmatprep.subr.bf16.mxu1 %v2917_v20 }
 0x1fd   :  { %2320 = vmatmul.mubr.f32.gmra.mrb[6].mxu0 %v2041_v24  ;;  %v2237_v24 = vld [vmem:[#allocation5 + $0x4] sm:$0x3] }
 0x1fe   :  { %3027 = vmatpush1.bf16.msra.mxu0 %v3687_v23  ;;  %v2909_v23 = vld [vmem:[#allocation10 + $0x38] sm:$0xff]  }
 0x1ff   :  { %3029 = vmatprep.subr.bf16.mxu0 %v3688_v27  ;;  %3131 = vmatpush3.bf16.msra.mxu1 %v2909_v23  ;;  %v2242_v27 = vrot.slane %v2237_v24, %v355_v61 }
 0x202   :  { %3031 = vmatpush1.bf16.msra.mxu0 %v3690_v29 }
 0x203   :  { %3033 = vmatprep.subr.bf16.mxu0 %v3691_v30 }
 0x206   :  { %3035 = vmatpush1.bf16.msra.mxu0 %v3693_v21 }
 0x207   :  { %3037 = vmatprep.subr.bf16.mxu0 %v3694_v32 }
 0x20a   :  { %3039 = vmatpush1.bf16.msra.mxu0 %v3696_v16 }
 0x20b   :  { %3041 = vmatprep.subr.bf16.mxu0 %v3697_v34 }
 0x20e   :  { %3043 = vmatpush1.bf16.msra.mxu0 %v3699_v35  ;;  %v2838_v35 = vld [vmem:[#allocation5 + $0x6] ss:$0 sm:$0xff] }
 0x20f   :  { %3045 = vmatprep.subr.bf16.mxu0 %v3700_v38 }
 0x212   :  { %3047 = vmatpush1.bf16.msra.mxu0 %v3702_v37 }
 0x213   :  { %3049 = vmatprep.subr.bf16.mxu0 %v3703_v40 }
 0x216   :  { %3051 = vmatpush1.bf16.msra.mxu0 %v3705_v42 }
 0x217   :  { %3053 = vmatprep.subr.bf16.mxu0 %v3706_v44 }
 0x21a   :  { %3055 = vmatpush1.bf16.msra.mxu0 %v3708_v46 }
 0x21b   :  { %3057 = vmatprep.subr.bf16.mxu0 %v3709_v47 }
 0x21e   :  { %3059 = vmatpush1.bf16.msra.mxu0 %v3711_v48 }
 0x21f   :  { %3061 = vmatprep.subr.bf16.mxu0 %v3712_v49 }
 0x222   :  { %3063 = vmatpush1.bf16.msra.mxu0 %v3714_v50 }
 0x223   :  { %3065 = vmatprep.subr.bf16.mxu0 %v3715_v51 }
 0x226   :  { %3067 = vmatpush1.bf16.msra.mxu0 %v3717_v52 }
 0x227   :  { %3069 = vmatprep.subr.bf16.mxu0 %v3718_v53 }
 0x22a   :  { %3071 = vmatpush1.bf16.msra.mxu0 %v3720_v54 }
 0x22b   :  { %3073 = vmatprep.subr.bf16.mxu0 %v3721_v56 }
 0x22e   :  { %3075 = vmatpush1.bf16.msra.mxu0 %v3723_v57 }
 0x22f   :  { %3077 = vmatprep.subr.bf16.mxu0 %v3724_v58 }
 0x232   :  { %3079 = vmatpush1.bf16.msra.mxu0 %v3726_v59 }
 0x233   :  { %3081 = vmatprep.subr.bf16.mxu0 %v3727_v0 }
 0x236   :  { %3083 = vmatpush1.bf16.msra.mxu0 %v3729_v1 }
 0x237   :  { %3085 = vmatprep.subr.bf16.mxu0 %v4040_v28  ;;  %v2246_v28 = vrot.slane %v2237_v24, %v359_v63 }
 0x271   :  { %v2028_v5 = vpop.f32.mrb[4].mxu1 }
 0x272   :  { %v3140_v6 = vadd.f32 %v2028_v5, %v364_v26  ;;  %v2030_v7 = vpop.f32.mrb[5].mxu1 }
 0x273   :  { %v3141_v10 = vadd.f32 %v2030_v7, %v368_v4  ;;  %v2032_v11 = vpop.f32.mrb[6].mxu1 }
 0x274   :  { %v2034_v12 = vpop.f32.mrb[7].mxu1  ;;  %v2039_v15 = vmax.f32 %v3140_v6, 0.0  ;;  %v3142_v17 = vadd.f32 %v2032_v11, %v364_v26 }
 0x275   :  { %v2040_v13 = vmax.f32 %v3141_v10, 0.0  ;;  %v3143_v14 = vadd.f32 %v2034_v12, %v368_v4 }
 0x276   :  { %v2043_v19 = vmax.f32 %v3142_v17, 0.0 }
 0x277   :  { %v2044_v18 = vmax.f32 %v3143_v14, 0.0  ;;  %2390 = vmatprep.mubr.f32.mxu0 %v2040_v13 }
 0x278   :  { %2391 = vmatmul.mubr.f32.vlgmr.msra.gmra.mrb[4].mxu0 %v2039_v15 }
 0x279   :  { %2396 = vmatprep.mubr.f32.mxu0 %v2044_v18  ;;  %3087 = vmatpush3.bf16.msra.mxu0 %v4042_v8 }
 0x27a   :  { %3089 = vmatprep.subr.bf16.mxu0 %v4045_v31 }
 0x27c   :  { %2397 = vmatmul.mubr.f32.gmra.mrb[6].mxu0 %v2043_v19 }
 0x27d   :  { %3091 = vmatpush3.bf16.msra.mxu0 %v4049_v22 }
 0x27e   :  { %3093 = vmatprep.subr.bf16.mxu0 %v4051_v33 }
 0x281   :  { %3095 = vmatpush3.bf16.msra.mxu0 %v4055_v9 }
 0x282   :  { %3097 = vmatprep.subr.bf16.mxu0 %v4057_v25 }
 0x285   :  { %3099 = vmatpush3.bf16.msra.mxu0 %v4061_v36 }
 0x286   :  { %3101 = vmatprep.subr.bf16.mxu0 %v4063_v55 }
 0x289   :  { %3103 = vmatpush3.bf16.msra.mxu0 %v4067_v39 }
 0x28a   :  { %3105 = vmatprep.subr.bf16.mxu0 %v4069_v41 }
 0x28d   :  { %3107 = vmatpush3.bf16.msra.mxu0 %v4073_v43 }
 0x28e   :  { %3109 = vmatprep.subr.bf16.mxu0 %v4075_v45 }
 0x291   :  { %3111 = vmatpush3.bf16.msra.mxu0 %v2908_v62 }
 0x292   :  { %3113 = vmatprep.subr.bf16.mxu0 %v2917_v20 }
 0x295   :  { %3115 = vmatpush3.bf16.msra.mxu0 %v2909_v23 }
 0x34b   :  { %v2392_v29 = vpop.f32.mrb[4].mxu0 }
 0x34c   :  { %v3144_v8 = vadd.f32 %v2392_v29, %v2242_v27  ;;  %v2394_v30 = vpop.f32.mrb[5].mxu0 }
 0x34d   :  { %v3145_v31 = vadd.f32 %v2394_v30, %v2246_v28 }
 0x34e   :  { %v2403_v32 = vmax.f32 %v3144_v8, 0.0 }
 0x34f   :  { %v2404_v21 = vmax.f32 %v3145_v31, 0.0  ;;  %v2398_v22 = vpop.f32.mrb[6].mxu0 }
 0x350   :  { %v3146_v33 = vadd.f32 %v2398_v22, %v2242_v27  ;;  %v2400_v16 = vpop.f32.mrb[7].mxu0 }
 0x351   :  { %v3147_v9 = vadd.f32 %v2400_v16, %v2246_v28  ;;  %2542 = vmatprep.mubr.f32.mxu0 %v2404_v21 }
 0x352   :  { %2543 = vmatmul.mubr.f32.vlgmr.msra.gmra.mrb[8].mxu0 %v2403_v32  ;;  %v2405_v25 = vmax.f32 %v3146_v33, 0.0 }
 0x353   :  { %v2406_v34 = vmax.f32 %v3147_v9, 0.0 }
 0x355   :  { %2547 = vmatprep.mubr.f32.mxu1 %v2406_v34 }
 0x356   :  { %2548 = vmatmul.mubr.f32.vlgmr.msra.gmra.mrb[8].mxu1 %v2405_v25 }
 0x425   :  { %v2950_v61 = vpop.f32.mrb[8].mxu0 }
 0x426   :  { %v2951_v60 = vpop.f32.mrb[9].mxu0 }
 0x427   :  { %v2952_v63 = vadd.f32 %v2951_v60, %v2950_v61 }
 0x429   :  { %v2545_v36 = vadd.f32 %v2952_v63, %v2838_v35  ;;  %v2953_v38 = vpop.f32.mrb[8].mxu1 }
 0x42a   :  { %v2954_v55 = vpop.f32.mrb[9].mxu1 }
 0x42b   :  { %2553 = vst [vmem:[#allocation11] sm:$0xff] %v2545_v36  ;;  %v2955_v37 = vadd.f32 %v2954_v55, %v2953_v38 }
 0x42d   :  { %v2550_v39 = vadd.f32 %v2955_v37, %v2838_v35 }
 0x42f   :  { %2554 = vst [vmem:[#allocation11 + $0x8] sm:$0xff] %v2550_v39 }
 0x430   :  { %3851 = shalt.err (!%p3848_p2)
}
 0x431   :  { %s3852_s12 = scalar_lea.hbm %s4120_s5, 256 }
 0x432   :  { %p3853_p3 = scmp.ne.s32.totalorder %s4120_s5, %s3852_s12  ;;  %p3856_p4 = scmp.lt.u32.totalorder %s3852_s12, %s4120_s5 }
 0x434   :  { %p3858_p5 = pnand %p3856_p4, %p3853_p3 }
 0x436   :  { %3861 = shalt.err (!%p3858_p5)
}
 0x437   :  { %2566 = dma.vmem_to_hbm [thread:$0]  %s2561_s8, 256, %s4120_s5, [#allocation4], %s3872_s1, %s3872_s1, %s3873_s16  }
 0x438   :  { %3868 = dma.done.wait [#allocation4], 256  }
 0x439   :  { %3869 = vsyncadd [#allocation4], 4294967040 }
 0x43a   :  { %2570 = vsyncpa [#allocation3], 1 }
 0x43b   :  { %2571 = vsyncpa [#allocation6], 1 }
 0x43c   :  { %2572 = vsyncpa [#allocation9], 1 }
 0x43d   :  { %2573 = vsyncpa [#allocation4], 1 }

</bundles_post_ra>
